<compile_context>
chip_gen: v5e
topology: v5e:2x2
jax: 0.10.0
libtpu: 0.0.40
codegen_flags: <defaults>
</compile_context>

<pallas_src>
import jax
import jax.numpy as jnp
import numpy as np
from jax import lax
from jax.experimental import pallas as pl
from jax.experimental.pallas import tpu as pltpu


def _fold_bn(gamma, beta, mean, var, eps=1e-5):
    s = gamma / jnp.sqrt(var + eps)
    return s, beta - mean * s


def _round_up(v, m):
    return -(-v // m) * m


def hybrid_conv_forward(x, params, downsample=False):
    """Fused Pallas forward for HybridConvModule (inference-mode BatchNorm)."""
    if downsample:
        # TODO(synk): downsample=True path (5x5 / stride-2 depthwise conv1) not implemented in Pallas.
        raise NotImplementedError("downsample=True is not implemented in the Pallas path")

    N, C_in, H, W = x.shape
    C_out = params["pw1_w"].shape[0]
    P = H * W
    # Halo big enough for the dilation-4 taps (|offset| <= 4*W + 4), rounded to the 128-lane
    # tile: VMEM lane allocation is 128-padded anyway, and it keeps the interior/halo stores
    # unmasked. Only the halo columns are zeroed in-kernel.
    PAD = _round_up(4 * W + 4, 128)
    f32, bf16 = jnp.float32, jnp.bfloat16

    # ---------------- one-time wrapper-side weight folding / repacking ----------------
    s1, b1 = _fold_bn(params["bn1_g"], params["bn1_b"], params["bn1_m"], params["bn1_v"])
    s2, b2 = _fold_bn(params["bn2_g"], params["bn2_b"], params["bn2_m"], params["bn2_v"])
    b2 = b2 + s2 * (params["d1_b"] + params["d2_b"])
    s3, b3 = _fold_bn(params["bn3_g"], params["bn3_b"], params["bn3_m"], params["bn3_v"])
    b3 = b3 + s3 * params["dw3_b"]

    # stage 1: fuse depthwise3x3 * pointwise1x1 * bn1-scale -> (C_out, 9*C_in), bf16
    dw1 = params["dw1_w"][:, 0].reshape(C_in, 9)                       # [c, tap]
    wp1 = params["pw1_w"][:, :, 0, 0]                                  # [o, c]
    w1 = wp1[:, None, :] * dw1.T[None, :, :]                           # [o, tap, c]
    w1 = (s1[:, None, None] * w1).reshape(C_out, 9 * C_in).astype(bf16)

    # stage 2: stack the 18 dilated-conv taps -> (C_out, 18*C_out), bn2 scale folded, bf16
    taps2 = jnp.concatenate([params["d1_w"].reshape(C_out, C_out, 9),      # dil=2 taps 0..8
                             params["d2_w"].reshape(C_out, C_out, 9)],     # dil=4 taps 9..17
                            axis=2)                                        # [o, i, tap]
    w2 = (s2[:, None, None] * taps2.transpose(0, 2, 1)).reshape(C_out, 18 * C_out).astype(bf16)

    # stage 3: depthwise taps with bn3 scale folded (VPU broadcast multiplies), f32
    wdw3 = (s3[:, None] * params["dw3_w"][:, 0].reshape(C_out, 9)).T.reshape(9, C_out, 1).astype(f32)

    # stage 4: 1x1 adjust conv over concat([x1,x2,x3]) as a single (C_out, 3*C_out) matrix, bf16
    wadj = params["adj_w"][:, :, 0, 0].astype(bf16)

    col = lambda v: v.reshape(-1, 1).astype(f32)
    pow2_w = (W & (W - 1)) == 0

    # Images per grid step: amortize per-step overhead but keep >= 2 steps when N >= 2
    # so both v7x TensorCores get work.
    NB = 1
    for cand in range(min(N, 8), 0, -1):
        if N % cand == 0 and (N // cand >= 2 or N == 1):
            NB = cand
            break

    def kernel(x_ref, w1_ref, b1_ref, w2_ref, b2_ref, wdw3_ref, b3_ref,
               wadj_ref, badj_ref, out_ref, pad_in_ref, pad_mid_ref):
        # zero only the halo columns; interiors are fully overwritten every stage.
        pad_in_ref[:, :PAD] = jnp.zeros((C_in, PAD), f32)
        pad_in_ref[:, PAD + P:PAD + P + PAD] = jnp.zeros((C_in, PAD), f32)
        pad_mid_ref[:, :PAD] = jnp.zeros((C_out, PAD), f32)
        pad_mid_ref[:, PAD + P:PAD + P + PAD] = jnp.zeros((C_out, PAD), f32)

        # precompute the 6 distinct row-wrap lane masks once (dw in {+-1, +-2, +-4})
        C_max = max(C_in, C_out)
        lane = lax.broadcasted_iota(jnp.int32, (C_max, P), 1)
        colmod = (lane & (W - 1)) if pow2_w else (lane % W)
        masks = {}
        for dw in (1, 2, 4):
            masks[dw] = colmod < (W - dw)
            masks[-dw] = colmod >= dw
        masks_in = masks if C_in == C_max else {k: v[:C_in] for k, v in masks.items()}
        masks_out = masks if C_out == C_max else {k: v[:C_out] for k, v in masks.items()}

        def shifted(buf, msk, dh, dw):
            # window[:, h*W + w] = image[:, h + dh, w + dw]   (0 outside the image)
            off = dh * W + dw
            win = buf[:, PAD + off: PAD + off + P]
            if dw != 0:
                win = jnp.where(msk[dw], win, 0.0)
            return win

        for img in range(NB):                                    # static, small
            # ---- stage 1: depthwise3x3 + pointwise1x1 + bn1 as ONE K=9*C_in MXU dot + ReLU ----
            pad_in_ref[:, PAD:PAD + P] = x_ref[img].astype(f32)
            buf = pad_in_ref[...]
            wins = [shifted(buf, masks_in, kh - 1, kw - 1)
                    for kh in range(3) for kw in range(3)]
            stk = jnp.concatenate(wins, axis=0).astype(bf16)     # (9*C_in, P)
            x1 = jnp.dot(w1_ref[...], stk, preferred_element_type=f32) + b1_ref[...]
            x1 = jnp.maximum(x1, 0.0)

            # ---- stage 2: both dilated 3x3 convs + bn2 as ONE K=18*C_out MXU dot + ReLU ----
            pad_mid_ref[:, PAD:PAD + P] = x1
            buf = pad_mid_ref[...]
            wins = [shifted(buf, masks_out, dil * (kh - 1), dil * (kw - 1))
                    for dil in (2, 4) for kh in range(3) for kw in range(3)]
            stk = jnp.concatenate(wins, axis=0).astype(bf16)     # (18*C_out, P)
            x2 = jnp.dot(w2_ref[...], stk, preferred_element_type=f32) + b2_ref[...]
            x2 = jnp.maximum(x2, 0.0)

            # ---- stage 3: depthwise 3x3 + bn3 + ReLU on the VPU (scale folded in taps) ----
            pad_mid_ref[:, PAD:PAD + P] = x2
            buf = pad_mid_ref[...]
            acc3 = jnp.zeros((C_out, P), f32)
            for kh in range(3):
                for kw in range(3):
                    acc3 = acc3 + wdw3_ref[kh * 3 + kw] * shifted(buf, masks_out, kh - 1, kw - 1)
            x3 = jnp.maximum(acc3 + b3_ref[...], 0.0)

            # ---- stage 4: 1x1 adjust conv over concat([x1,x2,x3]) as ONE K=3*C_out dot ----
            stk = jnp.concatenate([x1, x2, x3], axis=0).astype(bf16)   # (3*C_out, P)
            out = jnp.dot(wadj_ref[...], stk, preferred_element_type=f32) + badj_ref[...]
            out_ref[img] = out.astype(out_ref.dtype)             # lane-dense store

    zero2 = lambda n: (0, 0)
    zero3 = lambda n: (0, 0, 0)

    out_flat = pl.pallas_call(
        kernel,
        out_shape=jax.ShapeDtypeStruct((N, C_out, P), f32),
        grid=(N // NB,),
        in_specs=[
            pl.BlockSpec((NB, C_in, P), lambda n: (n, 0, 0)),    # x (native dtype, flattened spatial)
            pl.BlockSpec((C_out, 9 * C_in), zero2),              # fused dw1*pw1*bn1 weights (bf16)
            pl.BlockSpec((C_out, 1), zero2),                     # bn1 bias
            pl.BlockSpec((C_out, 18 * C_out), zero2),            # stacked dilated weights (bf16)
            pl.BlockSpec((C_out, 1), zero2),                     # bn2 bias (+ conv biases folded)
            pl.BlockSpec((9, C_out, 1), zero3),                  # depthwise_conv taps * bn3 scale
            pl.BlockSpec((C_out, 1), zero2),                     # bn3 bias (+ conv bias folded)
            pl.BlockSpec((C_out, 3 * C_out), zero2),             # adjust conv weights (bf16)
            pl.BlockSpec((C_out, 1), zero2),                     # adjust conv bias
        ],
        out_specs=pl.BlockSpec((NB, C_out, P), lambda n: (n, 0, 0)),
        scratch_shapes=[pltpu.VMEM((C_in, P + 2 * PAD), f32),    # zero-haloed input buffer
                        pltpu.VMEM((C_out, P + 2 * PAD), f32)],  # zero-haloed x1 / x2 buffer
        compiler_params=pltpu.CompilerParams(dimension_semantics=("parallel",)),
    )(x.reshape(N, C_in, P), w1, col(b1), w2, col(b2), wdw3, col(b3),
      wadj, col(params["adj_b"]))

    return out_flat.reshape(N, C_out, H, W)                      # free reshape, no transpose


def reference_forward(x, params, eps=1e-5):
    """Pure-JAX (XLA) reference mirroring HybridConvModule.forward (eval-mode BN)."""
    dn = ("NCHW", "OIHW", "NCHW")
    hp = lax.Precision.HIGHEST
    C_in = x.shape[1]

    def bn(y, g, b, m, v):
        sh = (1, -1, 1, 1)
        return (y - m.reshape(sh)) / jnp.sqrt(v.reshape(sh) + eps) * g.reshape(sh) + b.reshape(sh)

    def conv(lhs, w, pad, dil=1, groups=1):
        return lax.conv_general_dilated(
            lhs, w, (1, 1), ((pad, pad), (pad, pad)), rhs_dilation=(dil, dil),
            dimension_numbers=dn, feature_group_count=groups, precision=hp)

    x1 = conv(conv(x, params["dw1_w"], 1, groups=C_in), params["pw1_w"], 0)
    x1 = jax.nn.relu(bn(x1, params["bn1_g"], params["bn1_b"], params["bn1_m"], params["bn1_v"]))
    d1 = conv(x1, params["d1_w"], 2, dil=2) + params["d1_b"].reshape(1, -1, 1, 1)
    d2 = conv(x1, params["d2_w"], 4, dil=4) + params["d2_b"].reshape(1, -1, 1, 1)
    x2 = jax.nn.relu(bn(d1 + d2, params["bn2_g"], params["bn2_b"], params["bn2_m"], params["bn2_v"]))
    x3 = conv(x2, params["dw3_w"], 1, groups=x2.shape[1]) + params["dw3_b"].reshape(1, -1, 1, 1)
    x3 = jax.nn.relu(bn(x3, params["bn3_g"], params["bn3_b"], params["bn3_m"], params["bn3_v"]))
    fused = jnp.concatenate([x1, x2, x3], axis=1)
    return conv(fused, params["adj_w"], 0) + params["adj_b"].reshape(1, -1, 1, 1)


if __name__ == "__main__":
    N, C_in, C_out, H, W = 2, 4, 8, 16, 16
    kit = iter(jax.random.split(jax.random.PRNGKey(0), 32))

    def nrm(shape, scale):
        return scale * jax.random.normal(next(kit), shape, jnp.float32)

    def bn_par():
        return dict(g=1.0 + nrm((C_out,), 0.1), b=nrm((C_out,), 0.1),
                    m=nrm((C_out,), 0.1),
                    v=1.0 + 0.2 * jnp.abs(jax.random.normal(next(kit), (C_out,), jnp.float32)))

    x = jax.random.normal(next(kit), (N, C_in, H, W), jnp.float32)
    bn1, bn2, bn3 = bn_par(), bn_par(), bn_par()
    params = dict(
        dw1_w=nrm((C_in, 1, 3, 3), 0.3),
        pw1_w=nrm((C_out, C_in, 1, 1), 0.3),
        bn1_g=bn1["g"], bn1_b=bn1["b"], bn1_m=bn1["m"], bn1_v=bn1["v"],
        d1_w=nrm((C_out, C_out, 3, 3), 0.15), d1_b=nrm((C_out,), 0.1),
        d2_w=nrm((C_out, C_out, 3, 3), 0.15), d2_b=nrm((C_out,), 0.1),
        bn2_g=bn2["g"], bn2_b=bn2["b"], bn2_m=bn2["m"], bn2_v=bn2["v"],
        dw3_w=nrm((C_out, 1, 3, 3), 0.3), dw3_b=nrm((C_out,), 0.1),
        bn3_g=bn3["g"], bn3_b=bn3["b"], bn3_m=bn3["m"], bn3_v=bn3["v"],
        adj_w=nrm((C_out, 3 * C_out, 1, 1), 0.15), adj_b=nrm((C_out,), 0.1),
    )

    fwd = jax.jit(hybrid_conv_forward, static_argnames=("downsample",))
    out = jax.block_until_ready(fwd(x, params))
    ref = jax.block_until_ready(reference_forward(x, params))
    assert out.shape == ref.shape == (N, C_out, H, W), (out.shape, ref.shape)
    # bf16 MXU operands with f32 accumulation -> slightly looser tolerance than pure f32.
    np.testing.assert_allclose(np.asarray(out), np.asarray(ref), rtol=2e-2, atol=2e-2)
    print("KERNEL_OK")
</pallas_src>

<mosaic_0001>
module attributes {stable_mosaic.version = 11 : i64} {
  func.func @kernel(%arg0: i32, %arg1: memref<1x4x256xf32, #tpu.memory_space<vmem>>, %arg2: memref<8x36xbf16, #tpu.memory_space<vmem>>, %arg3: memref<8x1xf32, #tpu.memory_space<vmem>>, %arg4: memref<8x144xbf16, #tpu.memory_space<vmem>>, %arg5: memref<8x1xf32, #tpu.memory_space<vmem>>, %arg6: memref<9x8x1xf32, #tpu.memory_space<vmem>>, %arg7: memref<8x1xf32, #tpu.memory_space<vmem>>, %arg8: memref<8x24xbf16, #tpu.memory_space<vmem>>, %arg9: memref<8x1xf32, #tpu.memory_space<vmem>>, %arg10: memref<1x8x256xf32, #tpu.memory_space<vmem>>, %arg11: memref<4x512xf32, #tpu.memory_space<vmem>>, %arg12: memref<8x512xf32, #tpu.memory_space<vmem>>) attributes {dimension_semantics = [#tpu.dimension_semantics<parallel>], iteration_bounds = array<i64: 2>, scalar_prefetch = 0 : i64, scratch_operands = 2 : i64, tpu.core_type = #tpu.core_type<tc>, window_params = [{transform_indices = @transform_0, window_bounds = array<i64: 1, 4, 256>}, {pipeline_mode = #tpu.pipeline_mode<synchronous>, transform_indices = @transform_1, window_bounds = array<i64: 8, 36>}, {pipeline_mode = #tpu.pipeline_mode<synchronous>, transform_indices = @transform_2, window_bounds = array<i64: 8, 1>}, {pipeline_mode = #tpu.pipeline_mode<synchronous>, transform_indices = @transform_3, window_bounds = array<i64: 8, 144>}, {pipeline_mode = #tpu.pipeline_mode<synchronous>, transform_indices = @transform_4, window_bounds = array<i64: 8, 1>}, {pipeline_mode = #tpu.pipeline_mode<synchronous>, transform_indices = @transform_5, window_bounds = array<i64: 9, 8, 1>}, {pipeline_mode = #tpu.pipeline_mode<synchronous>, transform_indices = @transform_6, window_bounds = array<i64: 8, 1>}, {pipeline_mode = #tpu.pipeline_mode<synchronous>, transform_indices = @transform_7, window_bounds = array<i64: 8, 24>}, {pipeline_mode = #tpu.pipeline_mode<synchronous>, transform_indices = @transform_8, window_bounds = array<i64: 8, 1>}, {transform_indices = @transform_9, window_bounds = array<i64: 1, 8, 256>}]} {
    %cst = arith.constant 0.000000e+00 : f32
    %0 = vector.broadcast %cst : f32 to vector<4x128xf32>
    %c0 = arith.constant 0 : index
    %c0_0 = arith.constant 0 : index
    %1 = vector.load %arg11[%c0, %c0_0] : memref<4x512xf32, #tpu.memory_space<vmem>>, vector<4x128xf32>
    tpu.vector_store %arg11[%c0, %c0_0], %0 {strides = array<i32>} : memref<4x512xf32, #tpu.memory_space<vmem>>, vector<4x128xf32>,
    %cst_1 = arith.constant 0.000000e+00 : f32
    %2 = vector.broadcast %cst_1 : f32 to vector<4x128xf32>
    %c0_2 = arith.constant 0 : index
    %c384 = arith.constant 384 : index
    %3 = vector.load %arg11[%c0_2, %c384] : memref<4x512xf32, #tpu.memory_space<vmem>>, vector<4x128xf32>
    tpu.vector_store %arg11[%c0_2, %c384], %2 {strides = array<i32>} : memref<4x512xf32, #tpu.memory_space<vmem>>, vector<4x128xf32>,
    %cst_3 = arith.constant 0.000000e+00 : f32
    %4 = vector.broadcast %cst_3 : f32 to vector<8x128xf32>
    %c0_4 = arith.constant 0 : index
    %c0_5 = arith.constant 0 : index
    %5 = vector.load %arg12[%c0_4, %c0_5] : memref<8x512xf32, #tpu.memory_space<vmem>>, vector<8x128xf32>
    tpu.vector_store %arg12[%c0_4, %c0_5], %4 {strides = array<i32>} : memref<8x512xf32, #tpu.memory_space<vmem>>, vector<8x128xf32>,
    %cst_6 = arith.constant 0.000000e+00 : f32
    %6 = vector.broadcast %cst_6 : f32 to vector<8x128xf32>
    %c0_7 = arith.constant 0 : index
    %c384_8 = arith.constant 384 : index
    %7 = vector.load %arg12[%c0_7, %c384_8] : memref<8x512xf32, #tpu.memory_space<vmem>>, vector<8x128xf32>
    tpu.vector_store %arg12[%c0_7, %c384_8], %6 {strides = array<i32>} : memref<8x512xf32, #tpu.memory_space<vmem>>, vector<8x128xf32>,
    %8 = tpu.iota {dimensions = array<i32: 1>} : vector<8x256xi32>
    %c15_i32 = arith.constant 15 : i32
    %9 = vector.broadcast %c15_i32 : i32 to vector<8x256xi32>
    %10 = arith.andi %8, %9 : vector<8x256xi32>
    %c15_i32_9 = arith.constant 15 : i32
    %11 = vector.broadcast %c15_i32_9 : i32 to vector<8x256xi32>
    %12 = arith.cmpi slt, %10, %11 : vector<8x256xi32>
    %c1_i32 = arith.constant 1 : i32
    %13 = vector.broadcast %c1_i32 : i32 to vector<8x256xi32>
    %14 = arith.cmpi sge, %10, %13 : vector<8x256xi32>
    %c14_i32 = arith.constant 14 : i32
    %15 = vector.broadcast %c14_i32 : i32 to vector<8x256xi32>
    %16 = arith.cmpi slt, %10, %15 : vector<8x256xi32>
    %c2_i32 = arith.constant 2 : i32
    %17 = vector.broadcast %c2_i32 : i32 to vector<8x256xi32>
    %18 = arith.cmpi sge, %10, %17 : vector<8x256xi32>
    %c12_i32 = arith.constant 12 : i32
    %19 = vector.broadcast %c12_i32 : i32 to vector<8x256xi32>
    %20 = arith.cmpi slt, %10, %19 : vector<8x256xi32>
    %c4_i32 = arith.constant 4 : i32
    %21 = vector.broadcast %c4_i32 : i32 to vector<8x256xi32>
    %22 = arith.cmpi sge, %10, %21 : vector<8x256xi32>
    %23 = vector.extract_strided_slice %12 {offsets = [0, 0], sizes = [4, 256], strides = [1, 1]} : vector<8x256xi1> to vector<4x256xi1>
    %24 = vector.extract_strided_slice %14 {offsets = [0, 0], sizes = [4, 256], strides = [1, 1]} : vector<8x256xi1> to vector<4x256xi1>
    %c0_10 = arith.constant 0 : index
    %c0_11 = arith.constant 0 : index
    %c0_12 = arith.constant 0 : index
    %25 = vector.load %arg1[%c0_10, %c0_11, %c0_12] : memref<1x4x256xf32, #tpu.memory_space<vmem>>, vector<1x4x256xf32>
    %26 = vector.shape_cast %25 : vector<1x4x256xf32> to vector<4x256xf32>
    %c0_13 = arith.constant 0 : index
    %c128 = arith.constant 128 : index
    %27 = vector.load %arg11[%c0_13, %c128] : memref<4x512xf32, #tpu.memory_space<vmem>>, vector<4x256xf32>
    tpu.vector_store %arg11[%c0_13, %c128], %26 {strides = array<i32>} : memref<4x512xf32, #tpu.memory_space<vmem>>, vector<4x256xf32>,
    %c0_14 = arith.constant 0 : index
    %c0_15 = arith.constant 0 : index
    %28 = vector.load %arg11[%c0_14, %c0_15] : memref<4x512xf32, #tpu.memory_space<vmem>>, vector<4x512xf32>
    %29 = vector.extract_strided_slice %28 {offsets = [0, 111], sizes = [4, 256], strides = [1, 1]} : vector<4x512xf32> to vector<4x256xf32>
    %cst_16 = arith.constant 0.000000e+00 : f32
    %30 = vector.broadcast %cst_16 : f32 to vector<4x256xf32>
    %31 = arith.select %24, %29, %30 : vector<4x256xi1>, vector<4x256xf32>
    %32 = vector.extract_strided_slice %28 {offsets = [0, 112], sizes = [4, 256], strides = [1, 1]} : vector<4x512xf32> to vector<4x256xf32>
    %33 = vector.extract_strided_slice %28 {offsets = [0, 113], sizes = [4, 256], strides = [1, 1]} : vector<4x512xf32> to vector<4x256xf32>
    %cst_17 = arith.constant 0.000000e+00 : f32
    %34 = vector.broadcast %cst_17 : f32 to vector<4x256xf32>
    %35 = arith.select %23, %33, %34 : vector<4x256xi1>, vector<4x256xf32>
    %36 = vector.extract_strided_slice %28 {offsets = [0, 127], sizes = [4, 256], strides = [1, 1]} : vector<4x512xf32> to vector<4x256xf32>
    %cst_18 = arith.constant 0.000000e+00 : f32
    %37 = vector.broadcast %cst_18 : f32 to vector<4x256xf32>
    %38 = arith.select %24, %36, %37 : vector<4x256xi1>, vector<4x256xf32>
    %39 = vector.extract_strided_slice %28 {offsets = [0, 128], sizes = [4, 256], strides = [1, 1]} : vector<4x512xf32> to vector<4x256xf32>
    %40 = vector.extract_strided_slice %28 {offsets = [0, 129], sizes = [4, 256], strides = [1, 1]} : vector<4x512xf32> to vector<4x256xf32>
    %cst_19 = arith.constant 0.000000e+00 : f32
    %41 = vector.broadcast %cst_19 : f32 to vector<4x256xf32>
    %42 = arith.select %23, %40, %41 : vector<4x256xi1>, vector<4x256xf32>
    %43 = vector.extract_strided_slice %28 {offsets = [0, 143], sizes = [4, 256], strides = [1, 1]} : vector<4x512xf32> to vector<4x256xf32>
    %cst_20 = arith.constant 0.000000e+00 : f32
    %44 = vector.broadcast %cst_20 : f32 to vector<4x256xf32>
    %45 = arith.select %24, %43, %44 : vector<4x256xi1>, vector<4x256xf32>
    %46 = vector.extract_strided_slice %28 {offsets = [0, 144], sizes = [4, 256], strides = [1, 1]} : vector<4x512xf32> to vector<4x256xf32>
    %47 = vector.extract_strided_slice %28 {offsets = [0, 145], sizes = [4, 256], strides = [1, 1]} : vector<4x512xf32> to vector<4x256xf32>
    %cst_21 = arith.constant 0.000000e+00 : f32
    %48 = vector.broadcast %cst_21 : f32 to vector<4x256xf32>
    %49 = arith.select %23, %47, %48 : vector<4x256xi1>, vector<4x256xf32>
    %50 = tpu.concatenate %31, %32, %35, %38, %39, %42, %45, %46, %49 in 0 : vector<4x256xf32>, vector<4x256xf32>, vector<4x256xf32>, vector<4x256xf32>, vector<4x256xf32>, vector<4x256xf32>, vector<4x256xf32>, vector<4x256xf32>, vector<4x256xf32> -> vector<36x256xf32>
    %51 = arith.truncf %50 : vector<36x256xf32> to vector<36x256xbf16>
    %c0_22 = arith.constant 0 : index
    %c0_23 = arith.constant 0 : index
    %52 = vector.load %arg2[%c0_22, %c0_23] : memref<8x36xbf16, #tpu.memory_space<vmem>>, vector<8x36xbf16>
    %cst_24 = arith.constant dense<0.000000e+00> : vector<8x256xf32>
    %53 = tpu.matmul %52, %51, %cst_24 {dimension_numbers = #tpu.dot_dimension_numbers<[1], [0], [0], [1], [0, 0, 1, 1], [], []>} : vector<8x36xbf16>, vector<36x256xbf16>, vector<8x256xf32> -> vector<8x256xf32>
    %c0_25 = arith.constant 0 : index
    %c0_26 = arith.constant 0 : index
    %54 = vector.load %arg3[%c0_25, %c0_26] : memref<8x1xf32, #tpu.memory_space<vmem>>, vector<8x1xf32>
    %55 = vector.broadcast %54 : vector<8x1xf32> to vector<8x256xf32>
    %56 = arith.addf %53, %55 : vector<8x256xf32>
    %cst_27 = arith.constant 0.000000e+00 : f32
    %57 = vector.broadcast %cst_27 : f32 to vector<8x256xf32>
    %58 = arith.maximumf %56, %57 : vector<8x256xf32>
    %c0_28 = arith.constant 0 : index
    %c128_29 = arith.constant 128 : index
    %59 = vector.load %arg12[%c0_28, %c128_29] : memref<8x512xf32, #tpu.memory_space<vmem>>, vector<8x256xf32>
    tpu.vector_store %arg12[%c0_28, %c128_29], %58 {strides = array<i32>} : memref<8x512xf32, #tpu.memory_space<vmem>>, vector<8x256xf32>,
    %c0_30 = arith.constant 0 : index
    %c0_31 = arith.constant 0 : index
    %60 = vector.load %arg12[%c0_30, %c0_31] : memref<8x512xf32, #tpu.memory_space<vmem>>, vector<8x512xf32>
    %61 = vector.extract_strided_slice %60 {offsets = [0, 94], sizes = [8, 256], strides = [1, 1]} : vector<8x512xf32> to vector<8x256xf32>
    %cst_32 = arith.constant 0.000000e+00 : f32
    %62 = vector.broadcast %cst_32 : f32 to vector<8x256xf32>
    %63 = arith.select %18, %61, %62 : vector<8x256xi1>, vector<8x256xf32>
    %64 = vector.extract_strided_slice %60 {offsets = [0, 96], sizes = [8, 256], strides = [1, 1]} : vector<8x512xf32> to vector<8x256xf32>
    %65 = vector.extract_strided_slice %60 {offsets = [0, 98], sizes = [8, 256], strides = [1, 1]} : vector<8x512xf32> to vector<8x256xf32>
    %cst_33 = arith.constant 0.000000e+00 : f32
    %66 = vector.broadcast %cst_33 : f32 to vector<8x256xf32>
    %67 = arith.select %16, %65, %66 : vector<8x256xi1>, vector<8x256xf32>
    %68 = vector.extract_strided_slice %60 {offsets = [0, 126], sizes = [8, 256], strides = [1, 1]} : vector<8x512xf32> to vector<8x256xf32>
    %cst_34 = arith.constant 0.000000e+00 : f32
    %69 = vector.broadcast %cst_34 : f32 to vector<8x256xf32>
    %70 = arith.select %18, %68, %69 : vector<8x256xi1>, vector<8x256xf32>
    %71 = vector.extract_strided_slice %60 {offsets = [0, 128], sizes = [8, 256], strides = [1, 1]} : vector<8x512xf32> to vector<8x256xf32>
    %72 = vector.extract_strided_slice %60 {offsets = [0, 130], sizes = [8, 256], strides = [1, 1]} : vector<8x512xf32> to vector<8x256xf32>
    %cst_35 = arith.constant 0.000000e+00 : f32
    %73 = vector.broadcast %cst_35 : f32 to vector<8x256xf32>
    %74 = arith.select %16, %72, %73 : vector<8x256xi1>, vector<8x256xf32>
    %75 = vector.extract_strided_slice %60 {offsets = [0, 158], sizes = [8, 256], strides = [1, 1]} : vector<8x512xf32> to vector<8x256xf32>
    %cst_36 = arith.constant 0.000000e+00 : f32
    %76 = vector.broadcast %cst_36 : f32 to vector<8x256xf32>
    %77 = arith.select %18, %75, %76 : vector<8x256xi1>, vector<8x256xf32>
    %78 = vector.extract_strided_slice %60 {offsets = [0, 160], sizes = [8, 256], strides = [1, 1]} : vector<8x512xf32> to vector<8x256xf32>
    %79 = vector.extract_strided_slice %60 {offsets = [0, 162], sizes = [8, 256], strides = [1, 1]} : vector<8x512xf32> to vector<8x256xf32>
    %cst_37 = arith.constant 0.000000e+00 : f32
    %80 = vector.broadcast %cst_37 : f32 to vector<8x256xf32>
    %81 = arith.select %16, %79, %80 : vector<8x256xi1>, vector<8x256xf32>
    %82 = vector.extract_strided_slice %60 {offsets = [0, 60], sizes = [8, 256], strides = [1, 1]} : vector<8x512xf32> to vector<8x256xf32>
    %cst_38 = arith.constant 0.000000e+00 : f32
    %83 = vector.broadcast %cst_38 : f32 to vector<8x256xf32>
    %84 = arith.select %22, %82, %83 : vector<8x256xi1>, vector<8x256xf32>
    %85 = vector.extract_strided_slice %60 {offsets = [0, 64], sizes = [8, 256], strides = [1, 1]} : vector<8x512xf32> to vector<8x256xf32>
    %86 = vector.extract_strided_slice %60 {offsets = [0, 68], sizes = [8, 256], strides = [1, 1]} : vector<8x512xf32> to vector<8x256xf32>
    %cst_39 = arith.constant 0.000000e+00 : f32
    %87 = vector.broadcast %cst_39 : f32 to vector<8x256xf32>
    %88 = arith.select %20, %86, %87 : vector<8x256xi1>, vector<8x256xf32>
    %89 = vector.extract_strided_slice %60 {offsets = [0, 124], sizes = [8, 256], strides = [1, 1]} : vector<8x512xf32> to vector<8x256xf32>
    %cst_40 = arith.constant 0.000000e+00 : f32
    %90 = vector.broadcast %cst_40 : f32 to vector<8x256xf32>
    %91 = arith.select %22, %89, %90 : vector<8x256xi1>, vector<8x256xf32>
    %92 = vector.extract_strided_slice %60 {offsets = [0, 128], sizes = [8, 256], strides = [1, 1]} : vector<8x512xf32> to vector<8x256xf32>
    %93 = vector.extract_strided_slice %60 {offsets = [0, 132], sizes = [8, 256], strides = [1, 1]} : vector<8x512xf32> to vector<8x256xf32>
    %cst_41 = arith.constant 0.000000e+00 : f32
    %94 = vector.broadcast %cst_41 : f32 to vector<8x256xf32>
    %95 = arith.select %20, %93, %94 : vector<8x256xi1>, vector<8x256xf32>
    %96 = vector.extract_strided_slice %60 {offsets = [0, 188], sizes = [8, 256], strides = [1, 1]} : vector<8x512xf32> to vector<8x256xf32>
    %cst_42 = arith.constant 0.000000e+00 : f32
    %97 = vector.broadcast %cst_42 : f32 to vector<8x256xf32>
    %98 = arith.select %22, %96, %97 : vector<8x256xi1>, vector<8x256xf32>
    %99 = vector.extract_strided_slice %60 {offsets = [0, 192], sizes = [8, 256], strides = [1, 1]} : vector<8x512xf32> to vector<8x256xf32>
    %100 = vector.extract_strided_slice %60 {offsets = [0, 196], sizes = [8, 256], strides = [1, 1]} : vector<8x512xf32> to vector<8x256xf32>
    %cst_43 = arith.constant 0.000000e+00 : f32
    %101 = vector.broadcast %cst_43 : f32 to vector<8x256xf32>
    %102 = arith.select %20, %100, %101 : vector<8x256xi1>, vector<8x256xf32>
    %103 = tpu.concatenate %63, %64, %67, %70, %71, %74, %77, %78, %81, %84, %85, %88, %91, %92, %95, %98 in 0 : vector<8x256xf32>, vector<8x256xf32>, vector<8x256xf32>, vector<8x256xf32>, vector<8x256xf32>, vector<8x256xf32>, vector<8x256xf32>, vector<8x256xf32>, vector<8x256xf32>, vector<8x256xf32>, vector<8x256xf32>, vector<8x256xf32>, vector<8x256xf32>, vector<8x256xf32>, vector<8x256xf32>, vector<8x256xf32> -> vector<128x256xf32>
    %104 = tpu.concatenate %99, %102 in 0 : vector<8x256xf32>, vector<8x256xf32> -> vector<16x256xf32>
    %105 = tpu.concatenate %103, %104 in 0 : vector<128x256xf32>, vector<16x256xf32> -> vector<144x256xf32>
    %106 = arith.truncf %105 : vector<144x256xf32> to vector<144x256xbf16>
    %c0_44 = arith.constant 0 : index
    %c0_45 = arith.constant 0 : index
    %107 = vector.load %arg4[%c0_44, %c0_45] : memref<8x144xbf16, #tpu.memory_space<vmem>>, vector<8x144xbf16>
    %cst_46 = arith.constant dense<0.000000e+00> : vector<8x256xf32>
    %108 = tpu.matmul %107, %106, %cst_46 {dimension_numbers = #tpu.dot_dimension_numbers<[1], [0], [0], [1], [0, 0, 1, 1], [], []>} : vector<8x144xbf16>, vector<144x256xbf16>, vector<8x256xf32> -> vector<8x256xf32>
    %c0_47 = arith.constant 0 : index
    %c0_48 = arith.constant 0 : index
    %109 = vector.load %arg5[%c0_47, %c0_48] : memref<8x1xf32, #tpu.memory_space<vmem>>, vector<8x1xf32>
    %110 = vector.broadcast %109 : vector<8x1xf32> to vector<8x256xf32>
    %111 = arith.addf %108, %110 : vector<8x256xf32>
    %cst_49 = arith.constant 0.000000e+00 : f32
    %112 = vector.broadcast %cst_49 : f32 to vector<8x256xf32>
    %113 = arith.maximumf %111, %112 : vector<8x256xf32>
    %c0_50 = arith.constant 0 : index
    %c128_51 = arith.constant 128 : index
    %114 = vector.load %arg12[%c0_50, %c128_51] : memref<8x512xf32, #tpu.memory_space<vmem>>, vector<8x256xf32>
    tpu.vector_store %arg12[%c0_50, %c128_51], %113 {strides = array<i32>} : memref<8x512xf32, #tpu.memory_space<vmem>>, vector<8x256xf32>,
    %c0_52 = arith.constant 0 : index
    %c0_53 = arith.constant 0 : index
    %115 = vector.load %arg12[%c0_52, %c0_53] : memref<8x512xf32, #tpu.memory_space<vmem>>, vector<8x512xf32>
    %cst_54 = arith.constant 0.000000e+00 : f32
    %116 = vector.broadcast %cst_54 : f32 to vector<8x256xf32>
    %c0_55 = arith.constant 0 : index
    %c0_56 = arith.constant 0 : index
    %c0_57 = arith.constant 0 : index
    %117 = vector.load %arg6[%c0_55, %c0_56, %c0_57] : memref<9x8x1xf32, #tpu.memory_space<vmem>>, vector<1x8x1xf32>
    %118 = vector.shape_cast %117 : vector<1x8x1xf32> to vector<8x1xf32>
    %119 = vector.extract_strided_slice %115 {offsets = [0, 111], sizes = [8, 256], strides = [1, 1]} : vector<8x512xf32> to vector<8x256xf32>
    %cst_58 = arith.constant 0.000000e+00 : f32
    %120 = vector.broadcast %cst_58 : f32 to vector<8x256xf32>
    %121 = arith.select %14, %119, %120 : vector<8x256xi1>, vector<8x256xf32>
    %122 = vector.broadcast %118 : vector<8x1xf32> to vector<8x256xf32>
    %123 = arith.mulf %122, %121 : vector<8x256xf32>
    %124 = arith.addf %116, %123 : vector<8x256xf32>
    %c1 = arith.constant 1 : index
    %c0_59 = arith.constant 0 : index
    %c0_60 = arith.constant 0 : index
    %125 = vector.load %arg6[%c1, %c0_59, %c0_60] : memref<9x8x1xf32, #tpu.memory_space<vmem>>, vector<1x8x1xf32>
    %126 = vector.shape_cast %125 : vector<1x8x1xf32> to vector<8x1xf32>
    %127 = vector.extract_strided_slice %115 {offsets = [0, 112], sizes = [8, 256], strides = [1, 1]} : vector<8x512xf32> to vector<8x256xf32>
    %128 = vector.broadcast %126 : vector<8x1xf32> to vector<8x256xf32>
    %129 = arith.mulf %128, %127 : vector<8x256xf32>
    %130 = arith.addf %124, %129 : vector<8x256xf32>
    %c2 = arith.constant 2 : index
    %c0_61 = arith.constant 0 : index
    %c0_62 = arith.constant 0 : index
    %131 = vector.load %arg6[%c2, %c0_61, %c0_62] : memref<9x8x1xf32, #tpu.memory_space<vmem>>, vector<1x8x1xf32>
    %132 = vector.shape_cast %131 : vector<1x8x1xf32> to vector<8x1xf32>
    %133 = vector.extract_strided_slice %115 {offsets = [0, 113], sizes = [8, 256], strides = [1, 1]} : vector<8x512xf32> to vector<8x256xf32>
    %cst_63 = arith.constant 0.000000e+00 : f32
    %134 = vector.broadcast %cst_63 : f32 to vector<8x256xf32>
    %135 = arith.select %12, %133, %134 : vector<8x256xi1>, vector<8x256xf32>
    %136 = vector.broadcast %132 : vector<8x1xf32> to vector<8x256xf32>
    %137 = arith.mulf %136, %135 : vector<8x256xf32>
    %138 = arith.addf %130, %137 : vector<8x256xf32>
    %c3 = arith.constant 3 : index
    %c0_64 = arith.constant 0 : index
    %c0_65 = arith.constant 0 : index
    %139 = vector.load %arg6[%c3, %c0_64, %c0_65] : memref<9x8x1xf32, #tpu.memory_space<vmem>>, vector<1x8x1xf32>
    %140 = vector.shape_cast %139 : vector<1x8x1xf32> to vector<8x1xf32>
    %141 = vector.extract_strided_slice %115 {offsets = [0, 127], sizes = [8, 256], strides = [1, 1]} : vector<8x512xf32> to vector<8x256xf32>
    %cst_66 = arith.constant 0.000000e+00 : f32
    %142 = vector.broadcast %cst_66 : f32 to vector<8x256xf32>
    %143 = arith.select %14, %141, %142 : vector<8x256xi1>, vector<8x256xf32>
    %144 = vector.broadcast %140 : vector<8x1xf32> to vector<8x256xf32>
    %145 = arith.mulf %144, %143 : vector<8x256xf32>
    %146 = arith.addf %138, %145 : vector<8x256xf32>
    %c4 = arith.constant 4 : index
    %c0_67 = arith.constant 0 : index
    %c0_68 = arith.constant 0 : index
    %147 = vector.load %arg6[%c4, %c0_67, %c0_68] : memref<9x8x1xf32, #tpu.memory_space<vmem>>, vector<1x8x1xf32>
    %148 = vector.shape_cast %147 : vector<1x8x1xf32> to vector<8x1xf32>
    %149 = vector.extract_strided_slice %115 {offsets = [0, 128], sizes = [8, 256], strides = [1, 1]} : vector<8x512xf32> to vector<8x256xf32>
    %150 = vector.broadcast %148 : vector<8x1xf32> to vector<8x256xf32>
    %151 = arith.mulf %150, %149 : vector<8x256xf32>
    %152 = arith.addf %146, %151 : vector<8x256xf32>
    %c5 = arith.constant 5 : index
    %c0_69 = arith.constant 0 : index
    %c0_70 = arith.constant 0 : index
    %153 = vector.load %arg6[%c5, %c0_69, %c0_70] : memref<9x8x1xf32, #tpu.memory_space<vmem>>, vector<1x8x1xf32>
    %154 = vector.shape_cast %153 : vector<1x8x1xf32> to vector<8x1xf32>
    %155 = vector.extract_strided_slice %115 {offsets = [0, 129], sizes = [8, 256], strides = [1, 1]} : vector<8x512xf32> to vector<8x256xf32>
    %cst_71 = arith.constant 0.000000e+00 : f32
    %156 = vector.broadcast %cst_71 : f32 to vector<8x256xf32>
    %157 = arith.select %12, %155, %156 : vector<8x256xi1>, vector<8x256xf32>
    %158 = vector.broadcast %154 : vector<8x1xf32> to vector<8x256xf32>
    %159 = arith.mulf %158, %157 : vector<8x256xf32>
    %160 = arith.addf %152, %159 : vector<8x256xf32>
    %c6 = arith.constant 6 : index
    %c0_72 = arith.constant 0 : index
    %c0_73 = arith.constant 0 : index
    %161 = vector.load %arg6[%c6, %c0_72, %c0_73] : memref<9x8x1xf32, #tpu.memory_space<vmem>>, vector<1x8x1xf32>
    %162 = vector.shape_cast %161 : vector<1x8x1xf32> to vector<8x1xf32>
    %163 = vector.extract_strided_slice %115 {offsets = [0, 143], sizes = [8, 256], strides = [1, 1]} : vector<8x512xf32> to vector<8x256xf32>
    %cst_74 = arith.constant 0.000000e+00 : f32
    %164 = vector.broadcast %cst_74 : f32 to vector<8x256xf32>
    %165 = arith.select %14, %163, %164 : vector<8x256xi1>, vector<8x256xf32>
    %166 = vector.broadcast %162 : vector<8x1xf32> to vector<8x256xf32>
    %167 = arith.mulf %166, %165 : vector<8x256xf32>
    %168 = arith.addf %160, %167 : vector<8x256xf32>
    %c7 = arith.constant 7 : index
    %c0_75 = arith.constant 0 : index
    %c0_76 = arith.constant 0 : index
    %169 = vector.load %arg6[%c7, %c0_75, %c0_76] : memref<9x8x1xf32, #tpu.memory_space<vmem>>, vector<1x8x1xf32>
    %170 = vector.shape_cast %169 : vector<1x8x1xf32> to vector<8x1xf32>
    %171 = vector.extract_strided_slice %115 {offsets = [0, 144], sizes = [8, 256], strides = [1, 1]} : vector<8x512xf32> to vector<8x256xf32>
    %172 = vector.broadcast %170 : vector<8x1xf32> to vector<8x256xf32>
    %173 = arith.mulf %172, %171 : vector<8x256xf32>
    %174 = arith.addf %168, %173 : vector<8x256xf32>
    %c8 = arith.constant 8 : index
    %c0_77 = arith.constant 0 : index
    %c0_78 = arith.constant 0 : index
    %175 = vector.load %arg6[%c8, %c0_77, %c0_78] : memref<9x8x1xf32, #tpu.memory_space<vmem>>, vector<1x8x1xf32>
    %176 = vector.shape_cast %175 : vector<1x8x1xf32> to vector<8x1xf32>
    %177 = vector.extract_strided_slice %115 {offsets = [0, 145], sizes = [8, 256], strides = [1, 1]} : vector<8x512xf32> to vector<8x256xf32>
    %cst_79 = arith.constant 0.000000e+00 : f32
    %178 = vector.broadcast %cst_79 : f32 to vector<8x256xf32>
    %179 = arith.select %12, %177, %178 : vector<8x256xi1>, vector<8x256xf32>
    %180 = vector.broadcast %176 : vector<8x1xf32> to vector<8x256xf32>
    %181 = arith.mulf %180, %179 : vector<8x256xf32>
    %182 = arith.addf %174, %181 : vector<8x256xf32>
    %c0_80 = arith.constant 0 : index
    %c0_81 = arith.constant 0 : index
    %183 = vector.load %arg7[%c0_80, %c0_81] : memref<8x1xf32, #tpu.memory_space<vmem>>, vector<8x1xf32>
    %184 = vector.broadcast %183 : vector<8x1xf32> to vector<8x256xf32>
    %185 = arith.addf %182, %184 : vector<8x256xf32>
    %cst_82 = arith.constant 0.000000e+00 : f32
    %186 = vector.broadcast %cst_82 : f32 to vector<8x256xf32>
    %187 = arith.maximumf %185, %186 : vector<8x256xf32>
    %188 = tpu.concatenate %58, %113, %187 in 0 : vector<8x256xf32>, vector<8x256xf32>, vector<8x256xf32> -> vector<24x256xf32>
    %189 = arith.truncf %188 : vector<24x256xf32> to vector<24x256xbf16>
    %c0_83 = arith.constant 0 : index
    %c0_84 = arith.constant 0 : index
    %190 = vector.load %arg8[%c0_83, %c0_84] : memref<8x24xbf16, #tpu.memory_space<vmem>>, vector<8x24xbf16>
    %cst_85 = arith.constant dense<0.000000e+00> : vector<8x256xf32>
    %191 = tpu.matmul %190, %189, %cst_85 {dimension_numbers = #tpu.dot_dimension_numbers<[1], [0], [0], [1], [0, 0, 1, 1], [], []>} : vector<8x24xbf16>, vector<24x256xbf16>, vector<8x256xf32> -> vector<8x256xf32>
    %c0_86 = arith.constant 0 : index
    %c0_87 = arith.constant 0 : index
    %192 = vector.load %arg9[%c0_86, %c0_87] : memref<8x1xf32, #tpu.memory_space<vmem>>, vector<8x1xf32>
    %193 = vector.broadcast %192 : vector<8x1xf32> to vector<8x256xf32>
    %194 = arith.addf %191, %193 : vector<8x256xf32>
    %c0_88 = arith.constant 0 : index
    %c0_89 = arith.constant 0 : index
    %c0_90 = arith.constant 0 : index
    %195 = vector.load %arg10[%c0_88, %c0_89, %c0_90] : memref<1x8x256xf32, #tpu.memory_space<vmem>>, vector<1x8x256xf32>
    %196 = vector.shape_cast %195 : vector<1x8x256xf32> to vector<8x256xf32>
    %197 = vector.shape_cast %194 : vector<8x256xf32> to vector<1x8x256xf32>
    tpu.vector_store %arg10[%c0_88, %c0_89, %c0_90], %197 {strides = array<i32>} : memref<1x8x256xf32, #tpu.memory_space<vmem>>, vector<1x8x256xf32>,
    return
  }
  func.func @transform_0(%arg0: i32) -> (i32, i32, i32) {
    %c0_i32 = arith.constant 0 : i32
    %c0_i32_0 = arith.constant 0 : i32
    %c0_i32_1 = arith.constant 0 : i32
    return %arg0, %c0_i32, %c0_i32_0 : i32, i32, i32
  }
  func.func @transform_1(%arg0: i32) -> (i32, i32) {
    %c0_i32 = arith.constant 0 : i32
    %c0_i32_0 = arith.constant 0 : i32
    %c0_i32_1 = arith.constant 0 : i32
    return %c0_i32, %c0_i32_0 : i32, i32
  }
  func.func @transform_2(%arg0: i32) -> (i32, i32) {
    %c0_i32 = arith.constant 0 : i32
    %c0_i32_0 = arith.constant 0 : i32
    %c0_i32_1 = arith.constant 0 : i32
    return %c0_i32, %c0_i32_0 : i32, i32
  }
  func.func @transform_3(%arg0: i32) -> (i32, i32) {
    %c0_i32 = arith.constant 0 : i32
    %c0_i32_0 = arith.constant 0 : i32
    %c0_i32_1 = arith.constant 0 : i32
    return %c0_i32, %c0_i32_0 : i32, i32
  }
  func.func @transform_4(%arg0: i32) -> (i32, i32) {
    %c0_i32 = arith.constant 0 : i32
    %c0_i32_0 = arith.constant 0 : i32
    %c0_i32_1 = arith.constant 0 : i32
    return %c0_i32, %c0_i32_0 : i32, i32
  }
  func.func @transform_5(%arg0: i32) -> (i32, i32, i32) {
    %c0_i32 = arith.constant 0 : i32
    %c0_i32_0 = arith.constant 0 : i32
    %c0_i32_1 = arith.constant 0 : i32
    %c0_i32_2 = arith.constant 0 : i32
    return %c0_i32, %c0_i32_0, %c0_i32_1 : i32, i32, i32
  }
  func.func @transform_6(%arg0: i32) -> (i32, i32) {
    %c0_i32 = arith.constant 0 : i32
    %c0_i32_0 = arith.constant 0 : i32
    %c0_i32_1 = arith.constant 0 : i32
    return %c0_i32, %c0_i32_0 : i32, i32
  }
  func.func @transform_7(%arg0: i32) -> (i32, i32) {
    %c0_i32 = arith.constant 0 : i32
    %c0_i32_0 = arith.constant 0 : i32
    %c0_i32_1 = arith.constant 0 : i32
    return %c0_i32, %c0_i32_0 : i32, i32
  }
  func.func @transform_8(%arg0: i32) -> (i32, i32) {
    %c0_i32 = arith.constant 0 : i32
    %c0_i32_0 = arith.constant 0 : i32
    %c0_i32_1 = arith.constant 0 : i32
    return %c0_i32, %c0_i32_0 : i32, i32
  }
  func.func @transform_9(%arg0: i32) -> (i32, i32, i32) {
    %c0_i32 = arith.constant 0 : i32
    %c0_i32_0 = arith.constant 0 : i32
    %c0_i32_1 = arith.constant 0 : i32
    return %arg0, %c0_i32, %c0_i32_0 : i32, i32, i32
  }
}

</mosaic_0001>

<bundles_post_ra>
// kernel: squeeze.6
= control target key start
LH: loop header
LB: loop body
LE: loop exit
PB: predicated region body
PF: predicated region fallthrough
CT: control target
= control target key end

     0   :  { %vm15_vm0 = vcmask 64512   ;;  %s59_s0 = inlined_call_operand.vmem [shape: f32[8,3,3], index: 0, kind: input, shape index: {}]   ;;  %s60_s1 = inlined_call_operand.vmem [shape: f32[8,9], index: 1, kind: output, shape index: {}]  }
   0x1   :  { %v27_v0 = vld [vmem:[%s59_s0 + $0x8] sm:$0xf]  ;;  %v28_v1 = vld [vmem:[%s59_s0 + $0x4] sm:$0xf]  ;;  %v12_v2 = vld [vmem:[%s59_s0] sm:$0xf] }
   0x2   :  { %7 = vst [vmem:[#allocation0] sm:$0xf] %v27_v0 }
   0x3   :  { %11 = vst [vmem:[#allocation0 + $0x10] sm:$0xf] %v28_v1 }
   0x4   :  { %13 = vst [vmem:[#allocation0 + $0x8] sm:$0xf] %v12_v2 }
   0x9   :  { %v23_v3 = vld [vmem:[#allocation0] sm:$0x7]  }
   0xa   :  { %v18_v4 = vld [vmem:[#allocation0 + $0x10] sm:$0x7]   ;;  %30 = vst.msk [vmem:[%s60_s1 + $0x6] sm:$0x7] %vm15_vm0, %v23_v3  }
   0xb   :  { %v14_v5 = vld [vmem:[#allocation0 + $0x8] sm:$0x7]   ;;  %29 = vst.msk [vmem:[%s60_s1 + $0x3] sm:$0x7] %vm15_vm0, %v18_v4  }
   0xc   :  { %16 = vst.msk [vmem:[%s60_s1] sm:$0x7] %vm15_vm0, %v14_v5  }

// kernel: hybrid_conv_forward.1
= control target key start
LH: loop header
LB: loop body
LE: loop exit
PB: predicated region body
PF: predicated region fallthrough
CT: control target
= control target key end

     0   :  { %s1524_s30 = smov 0   ;;  %s2079_s0 = inlined_call_operand.vmem [shape: f32[2,4,256], index: 0, kind: input, shape index: {}]   ;;  %s2080_s1 = inlined_call_operand.vmem [shape: bf16[8,36], index: 1, kind: input, shape index: {}]   ;;  %s2081_s2 = inlined_call_operand.vmem [shape: f32[8,1], index: 2, kind: input, shape index: {}]   ;;  %s2082_s3 = inlined_call_operand.vmem [shape: bf16[8,144], index: 3, kind: input, shape index: {}]   ;;  %s2083_s4 = inlined_call_operand.vmem [shape: f32[8,1], index: 4, kind: input, shape index: {}]   ;;  %s2084_s5 = inlined_call_operand.vmem [shape: f32[9,8,1], index: 5, kind: input, shape index: {}]   ;;  %s2085_s6 = inlined_call_operand.vmem [shape: f32[8,1], index: 6, kind: input, shape index: {}]   ;;  %s2086_s7 = inlined_call_operand.vmem [shape: bf16[8,24], index: 7, kind: input, shape index: {}]   ;;  %s2087_s8 = inlined_call_operand.vmem [shape: f32[8,1], index: 8, kind: input, shape index: {}]   ;;  %s2088_s9 = inlined_call_operand.vmem [shape: f32[2,8,256], index: 9, kind: output, shape index: {}]  }
   0x1 LB: > { %s1207_s10 = sadd.s32 4294967295, %s1448_s30   ;;  %p1211_p0 = scmp.ge.s32.totalorder %s1448_s30, 1  ;;  %s1448_s30 = sphi %s1524_s30, %s19_s30  }
   0x2   : > { %p287_p1 = scmp.lt.s32.totalorder %s1448_s30, 3 }
   0x4   : > { %p288_p2 = pnand %p1211_p0, %p287_p1 }
   0x5   : > { %p323_p3 = scmp.lt.s32.totalorder (!%p288_p2), %s1207_s10, 1  ;;  %s1451_s15 = smov (!%p288_p2), 17  }
   0x6   : > { %291 = sbr.rel (%p288_p2) target bundleno = 1175 (0x497), region = 56  ;;  %s1452_s16 = smov (!%p288_p2), 15  }
   0x7   : > { %s1453_s17 = smov (!%p288_p2), 1   ;;  %s1454_s18 = smov (!%p288_p2), 127  }
   0x8   : > { %s1455_s19 = smov (!%p288_p2), 113   ;;  %s1456_s20 = smov (!%p288_p2), 111  }
   0x9   : > { %s1457_s21 = smov (!%p288_p2), 16   ;;  %s1458_s22 = smov (!%p288_p2), 112  }
   0xa   : > { %s1459_s23 = smov (!%p288_p2), 60   ;;  %s1461_s28 = smov (!%p288_p2), 124  }
   0xb   : > { %v1450_v0 = vmov 0.0   ;;  %s2134_s10 = smov (!%p323_p3, %s1207_s10), 1  ;;  %v338_v43 = vlaneseq  ;;  %vm2091_vm0 = vcmask 908288   ;;  %vm556_vm2 = vcmask 1041408   ;;  %v546_v58 = vld [vmem:[%s2081_s2] sm:$0xff]  ;;  %s1462_s29 = smov 4  }
   0xc   : > { %335 = vst [vmem:[#allocation2 + $0xc] sm:$0xf] %v1450_v0  ;;  %s1280_s11 = sshll.u32 %s2134_s10, 3  ;;  %v1460_v60 = vmov 0   ;;  %vm2093_vm4 = vcmask 1039360   ;;  %vm2099_vm5 = vcmask 7168  }
   0xd   : > { %334 = vst [vmem:[#allocation2] sm:$0xf] %v1450_v0  ;;  %s327_s14 = scalar_lea.vmem %s2079_s0, %s1280_s11  ;;  %v339_v44 = vand.u32 127, %v338_v43  ;;  %1354 = vset.pattern.permute.xlu1 %v1460_v60  ;;  %1441 = vset.pattern.permute.xlu0 %v1460_v60  ;;  %vm2100_vm7 = vcmask 121856   ;;  %vm2098_vm8 = vcmask 138240   ;;  %vm2092_vm9 = vcmask 924672  }
   0xe   : > { %v355_v1 = vld [vmem:[%s327_s14] sm:$0xff]  ;;  %1440 = vset.pattern.permute.xlu2 %v1460_v60  ;;  %vm488_vm11 = vcmask 130048   ;;  %vm2090_vm12 = vcmask 916480   ;;  %vm2089_vm13 = vcmask 1043456   ;;  %vm552_vm14 = vcmask 293888   ;;  %s1463_s11 = smov 68  }
   0xf   : > { %356 = vst [vmem:[#allocation2 + $0x4] sm:$0xff] %v355_v1  ;;  %v340_v47 = vadd.s32 128, %v339_v44  ;;  %v1596_v50 = vand.u32 15, %v339_v44  ;;  %s1464_s12 = smov 64   ;;  %s1465_s13 = smov 94   ;;  %vm698_vm15 = vcmask 490496  }
  0x10   : > { %s1466_s14 = smov 98   ;;  %s1467_s24 = smov 126  }
  0x11   : > { %vm2097_vm1 = vcmp.lt.s32.totalorder %v1596_v50, 15  ;;  %v1602_v54 = vand.u32 15, %v340_v47  ;;  %vm2096_vm6 = vcmp.ge.s32.totalorder %v1596_v50, 1  ;;  %s1468_s25 = smov 30   ;;  %s1469_s26 = smov 96  }
  0x12   : > { %s1470_s27 = smov 34  }
  0x13   : > { %vm2094_vm3 = vcmp.lt.s32.totalorder %v1602_v54, 15  ;;  %vm2095_vm10 = vcmp.ge.s32.totalorder %v1602_v54, 1 }
  0x16   : > { %v1540_v2 = vld [vmem:[#allocation2 + $0x8] sm:$0xff]  ;;  %v1542_v3 = vld [vmem:[#allocation2] sm:$0xff] }
  0x17   : > { %363 = vst [vmem:[#allocation1 + $0x10] ss:$2 sm:$0xff] %v1540_v2 }
  0x18   : > { %361 = vst [vmem:[#allocation1] ss:$2 sm:$0xff] %v1542_v3 }
  0x1e   : > { %v366_v4 = vld.sshfl [vmem:[#allocation1 + $0x10] sm:$0xff pattern:$0x75316420] }
  0x1f   : > { %371 = vrot.lane.b32.xlu2 %v366_v4, %s1451_s15  ;;  %382 = vst [vmem:[#allocation1 + $0x10] ss:$2 sm:$0xff] %v1540_v2  ;;  %v364_v5 = vld.sshfl [vmem:[#allocation1] sm:$0xff pattern:$0x75316420] }
  0x20   : > { %v365_v6 = vld.sshfl [vmem:[#allocation1 + $0x8] sm:$0xff pattern:$0x75316420] }
  0x21   : > { %380 = vst [vmem:[#allocation1] ss:$2 sm:$0xff] %v1542_v3  ;;  %v1314_v7 = vpack.i.bf16 %v365_v6, %v364_v5 }
  0x23   : > { %1315 = vrot.lane.b32.xlu1 %v1314_v7, %s1451_s15 }
  0x26   : > { %v385_v8 = vld.sshfl [vmem:[#allocation1 + $0x10] sm:$0xff pattern:$0x75316420] }
  0x27   : > { %401 = vst [vmem:[#allocation1 + $0x10] ss:$2 sm:$0xff] %v1540_v2 }
  0x28   : > { %v383_v9 = vld.sshfl [vmem:[#allocation1] sm:$0xff pattern:$0x75316420]  ;;  %v384_v10 = vld.sshfl [vmem:[#allocation1 + $0x8] sm:$0xff pattern:$0x75316420] }
  0x29   : > { %v1319_v11 = vpack.i.bf16 %v384_v10, %v383_v9  ;;  %399 = vst [vmem:[#allocation1] ss:$2 sm:$0xff] %v1542_v3 }
  0x2b   : > { %1320 = vrot.lane.b32.xlu0 %v1319_v11, %s1452_s16 }
  0x2e   : > { %v404_v12 = vld.sshfl [vmem:[#allocation1 + $0x10] sm:$0xff pattern:$0x75316420] }
  0x2f   : > { %420 = vst [vmem:[#allocation1 + $0x10] ss:$2 sm:$0xff] %v1540_v2 }
  0x30   : > { %v402_v13 = vld.sshfl [vmem:[#allocation1] sm:$0xff pattern:$0x75316420]  ;;  %v403_v14 = vld.sshfl [vmem:[#allocation1 + $0x8] sm:$0xff pattern:$0x75316420] }
  0x31   : > { %v1324_v15 = vpack.i.bf16 %v403_v14, %v402_v13  ;;  %418 = vst [vmem:[#allocation1] ss:$2 sm:$0xff] %v1542_v3 }
  0x33   : > { %1325 = vrot.lane.b32.xlu2 %v1324_v15, %s1453_s17  ;;  %409 = vrot.lane.b32.xlu0 %v404_v12, %s1453_s17 }
  0x36   : > { %v422_v16 = vld.sshfl [vmem:[#allocation1 + $0x10] sm:$0xff pattern:$0x75316420]  ;;  %v423_v17 = vld.sshfl [vmem:[#allocation1 + $0x18] sm:$0xff pattern:$0x75316420] }
  0x37   : > { %439 = vst [vmem:[#allocation1 + $0x10] ss:$2 sm:$0xff] %v1540_v2 }
  0x38   : > { %v421_v18 = vld.sshfl [vmem:[#allocation1 + $0x8] sm:$0xff pattern:$0x75316420] }
  0x39   : > { %v1329_v19 = vpack.i.bf16 %v422_v16, %v421_v18  ;;  %437 = vst [vmem:[#allocation1] ss:$2 sm:$0xff] %v1542_v3 }
  0x3b   : > { %1330 = vrot.lane.b32.xlu1 %v1329_v19, %s1454_s18 }
  0x3e   : > { %v441_v20 = vld.sshfl [vmem:[#allocation1 + $0x10] sm:$0xff pattern:$0x75316420]  ;;  %v442_v21 = vld.sshfl [vmem:[#allocation1 + $0x18] sm:$0xff pattern:$0x75316420] }
  0x3f   : > { %458 = vst [vmem:[#allocation1 + $0x10] ss:$2 sm:$0xff] %v1540_v2 }
  0x40   : > { %v440_v22 = vld.sshfl [vmem:[#allocation1 + $0x8] sm:$0xff pattern:$0x75316420] }
  0x41   : > { %v1334_v23 = vpack.i.bf16 %v441_v20, %v440_v22  ;;  %456 = vst [vmem:[#allocation1] ss:$2 sm:$0xff] %v1542_v3 }
  0x43   : > { %1335 = vrot.lane.b32.xlu2 %v1334_v23, %s1455_s19  ;;  %428 = vrot.lane.b32.xlu1 %v423_v17, %s1454_s18 }
  0x46   : > { %v460_v24 = vld.sshfl [vmem:[#allocation1 + $0x10] sm:$0xff pattern:$0x75316420]  ;;  %v461_v25 = vld.sshfl [vmem:[#allocation1 + $0x18] sm:$0xff pattern:$0x75316420] }
  0x47   : > { %478 = vst [vmem:[#allocation1 + $0x11] ss:$2 sm:$0xff] %v1540_v2 }
  0x48   : > { %v459_v26 = vld.sshfl [vmem:[#allocation1 + $0x8] sm:$0xff pattern:$0x75316420] }
  0x49   : > { %v1339_v27 = vpack.i.bf16 %v460_v24, %v459_v26  ;;  %476 = vst [vmem:[#allocation1 + $0x1] ss:$2 sm:$0xff] %v1542_v3 }
  0x4b   : > { %1340 = vrot.lane.b32.xlu0 %v1339_v27, %s1456_s20  ;;  %447 = vrot.lane.b32.xlu2 %v442_v21, %s1455_s19 }
  0x4e   : > { %v481_v28 = vld.sshfl [vmem:[#allocation1 + $0x10] sm:$0xff pattern:$0x75316420] }
  0x4f   : > { %501 = vst [vmem:[#allocation1 + $0x10] ss:$2 sm:$0xff] %v1540_v2 }
  0x50   : > { %v479_v29 = vld.sshfl [vmem:[#allocation1] sm:$0xff pattern:$0x75316420]  ;;  %v480_v30 = vld.sshfl [vmem:[#allocation1 + $0x8] sm:$0xff pattern:$0x75316420] }
  0x51   : > { %v1349_v31 = vpack.i.bf16 %v480_v30, %v479_v29  ;;  %499 = vst [vmem:[#allocation1] ss:$2 sm:$0xff] %v1542_v3 }
  0x53   : > { %466 = vrot.lane.b32.xlu0 %v461_v25, %s1456_s20  ;;  %1350 = vrot.lane.b32.xlu2 %v1349_v31, %s1457_s21 }
  0x56   : > { %v1572_v32 = vld.sshfl [vmem:[#allocation1 + $0x10] sm:$0xff pattern:$0x75316420] }
  0x57   : > { %515 = vst [vmem:[#allocation1 + $0x11] ss:$2 sm:$0xff] %v1540_v2 }
  0x58   : > { %v1575_v33 = vld.sshfl [vmem:[#allocation1 + $0x8] sm:$0xff pattern:$0x75316420] }
  0x59   : > { %513 = vst [vmem:[#allocation1 + $0x1] ss:$2 sm:$0xff] %v1542_v3 }
  0x5e   : > { %v518_v34 = vld.sshfl [vmem:[#allocation1 + $0x18] sm:$0xff pattern:$0x75316420]  ;;  %v517_v35 = vld.sshfl [vmem:[#allocation1 + $0x10] sm:$0xff pattern:$0x75316420] }
  0x5f   : > { %523 = vrot.lane.b32.xlu1 %v518_v34, %s1458_s22 }
  0x60   : > { %v516_v36 = vld.sshfl [vmem:[#allocation1 + $0x8] sm:$0xff pattern:$0x75316420] }
  0x61   : > { %v1344_v37 = vpack.i.bf16 %v517_v35, %v516_v36 }
  0x63   : > { %1345 = vrot.lane.b32.xlu0 %v1344_v37, %s1458_s22 }
  0x67   : > { %390 = vrot.lane.b32.xlu1 %v385_v8, %s1452_s16 }
  0x6b   : > { %486 = vrot.lane.b32.xlu0 %v481_v28, %s1457_s21 }
  0x6f   : > { %549 = vperm.xlu1 %1354, %v546_v58  }
  0x73   : > { %737 = vrot.lane.b32.xlu0 %v1450_v0, %s1459_s23 }
  0x77   : > { %722 = vrot.lane.b32.xlu1 %v1450_v0, %s1461_s28 }
  0x79   : > { %v1584_v38 = vpop.permute.xlu2 %371 }
  0x8d   : > { %v1588_v40 = vpop.permute.xlu2 %1325 }
  0x8e   : > { %v1328_v5 = vunpack.i.h.bf16 %v1588_v40  ;;  %v1327_v6 = vunpack.i.l.bf16 %v1588_v40 }
  0x90   : > { %v412_v14 = vsel %vm2099_vm5, %v1327_v6, %v1328_v5 }
  0x91   : > { %v416_v22 = vsel %vm2096_vm6, %v412_v14, 0.0 }
  0x92   : > { %v495_v35 = vrot.slane %v416_v22, 4 }
  0x95   : > { %v1592_v42 = vpop.permute.xlu1 %1315 }
  0x96   : > { %v1318_v7 = vunpack.i.h.bf16 %v1592_v42  ;;  %v1317_v8 = vunpack.i.l.bf16 %v1592_v42 }
  0x98   : > { %v374_v20 = vsel %vm2098_vm8, %v1317_v8, %v1318_v7 }
  0x9d   : > { %v1586_v39 = vpop.permute.xlu0 %1320  ;;  %v1594_v45 = vpop.permute.xlu2 %1335 }
  0x9e   : > { %v1323_v9 = vunpack.i.h.bf16 %v1586_v39  ;;  %v1322_v10 = vunpack.i.l.bf16 %v1586_v39  ;;  %v1338_v13 = vunpack.i.h.bf16 %v1594_v45  ;;  %v1337_v15 = vunpack.i.l.bf16 %v1594_v45 }
  0x9f   : > { %v378_v39 = vsel %vm2096_vm6, %v374_v20, 0.0 }
  0xa0   : > { %v393_v21 = vsel %vm2100_vm7, %v1322_v10, %v1323_v9  ;;  %v450_v29 = vsel %vm2092_vm9, %v1337_v15, %v1338_v13 }
  0xa1   : > { %v397_v40 = vsel %vm2097_vm1, %v393_v21, 0.0 }
  0xa2   : > { %v533_v58 = vsel %vm2089_vm13, %v397_v40, %v495_v35 }
  0xa5   : > { %v1590_v41 = vpop.permute.xlu0 %409  ;;  %v448_v61 = vpop.permute.xlu2 %447 }
  0xa6   : > { %v451_v23 = vsel %vm2092_vm9, %v1338_v13, %v448_v61  ;;  %v413_v26 = vsel %vm2099_vm5, %v1328_v5, %v1590_v41  ;;  %v454_v41 = vsel %vm2096_vm6, %v450_v29, 0.0  ;;  %vm347_vm6 = vcmp.lt.s32.totalorder %v1596_v50, 14 }
  0xa7   : > { %v455_v36 = vsel %vm2095_vm10, %v451_v23, 0.0  ;;  %v417_v37 = vsel %vm2095_vm10, %v413_v26, 0.0 }
  0xad   : > { %v1331_v51 = vpop.permute.xlu1 %1330  ;;  %v1351_v16 = vpop.permute.xlu2 %1350 }
  0xae   : > { %v1333_v3 = vunpack.i.h.bf16 %v1331_v51  ;;  %v1332_v4 = vunpack.i.l.bf16 %v1331_v51  ;;  %v1353_v24 = vunpack.i.h.bf16 %v1351_v16  ;;  %v1352_v25 = vunpack.i.l.bf16 %v1351_v16 }
  0xb0   : > { %v431_v12 = vsel %vm2093_vm4, %v1332_v4, %v1333_v3  ;;  %v489_v44 = vsel %vm488_vm11, %v1352_v25, %v1353_v24 }
  0xb1   : > { %v435_v19 = vsel %vm2097_vm1, %v431_v12, 0.0 }
  0xb2   : > { %v508_v30 = vrot.slane %v435_v19, 4 }
  0xb5   : > { %v429_v1 = vpop.permute.xlu1 %428 }
  0xb6   : > { %v432_v11 = vsel %vm2093_vm4, %v1333_v3, %v429_v1  ;;  %v545_v1 = vld [vmem:[%s2080_s1] sm:$0xf]  ;;  %vm711_vm4 = vcmask 31744  }
  0xb7   : > { %v436_v18 = vsel %vm2094_vm3, %v432_v11, 0.0 }
  0xb8   : > { %v509_v27 = vrot.slane %v436_v18, 4 }
  0xbd   : > { %v1341_v46 = vpop.permute.xlu0 %1340 }
  0xbe   : > { %v1343_v48 = vunpack.i.h.bf16 %v1341_v46  ;;  %v1342_v49 = vunpack.i.l.bf16 %v1341_v46  ;;  %v535_v46 = vsel %vm2089_vm13, %v1575_v33, %v508_v30  ;;  %v531_v33 = vsel %vm2089_vm13, %v378_v39, %v489_v44  ;;  %v1268_v44 = vld [vmem:[%s2084_s5 + $0x8] sm:$0xff] }
  0xbf   : > { %v539_v61 = vpack.c.bf16 %v533_v58, %v531_v33 }
  0xc0   : > { %v469_v52 = vsel %vm2091_vm0, %v1342_v49, %v1343_v48 }
  0xc1   : > { %v473_v53 = vsel %vm2097_vm1, %v469_v52, 0.0  ;;  %vm619_vm1 = vcmask 244736  }
  0xc2   : > { %v543_v55 = vpack.c.bf16 %v473_v53, %v473_v53 }
  0xc4   : > { %v558_v56 = vsel %vm556_vm2, %v543_v55, 0  ;;  %v375_v55 = vsel %vm2098_vm8, %v1318_v7, %v1584_v38  ;;  %vm606_vm8 = vcmask 277504  }
  0xc5   : > { %v467_v57 = vpop.permute.xlu0 %466  ;;  %568 = vmatpush.bf16.msra.mxu0 %v558_v56  ;;  %v496_v56 = vrot.slane %v417_v37, 4 }
  0xc6   : > { %v470_v59 = vsel %vm2091_vm0, %v1343_v48, %v467_v57  ;;  %v536_v48 = vsel %vm2089_vm13, %v1572_v32, %v509_v27  ;;  %vm353_vm0 = vcmp.ge.s32.totalorder %v1596_v50, 4 }
  0xc7   : > { %v474_v62 = vsel %vm2094_vm3, %v470_v59, 0.0 }
  0xc8   : > { %v544_v63 = vpack.c.bf16 %v474_v62, %v474_v62  ;;  %v379_v62 = vsel %vm2095_vm10, %v375_v55, 0.0  ;;  %vm672_vm10 = vcmask 769024  }
  0xca   : > { %v561_v2 = vsel %vm556_vm2, %v544_v63, 0  ;;  %vm351_vm2 = vcmp.lt.s32.totalorder %v1596_v50, 12 }
  0xcb   : > { %581 = vmatpush.bf16.msra.mxu1 %v561_v2  ;;  %vm1218_vm9 = vmpackc.low %vm353_vm0, %vm351_vm2 }
  0xd1   : > { %v524_v17 = vpop.permute.xlu1 %523 }
  0xd5   : > { %v1346_v28 = vpop.permute.xlu0 %1345 }
  0xd6   : > { %v1348_v31 = vunpack.i.h.bf16 %v1346_v28  ;;  %v1347_v34 = vunpack.i.l.bf16 %v1346_v28 }
  0xd8   : > { %v526_v42 = vsel %vm2090_vm12, %v1347_v34, %v1348_v31  ;;  %v527_v43 = vsel %vm2090_vm12, %v1348_v31, %v524_v17  ;;  %vm724_vm12 = vcmask 1014784  }
  0xd9   : > { %v391_v45 = vpop.permute.xlu1 %390  ;;  %v537_v47 = vsel %vm2089_vm13, %v454_v41, %v526_v42  ;;  %v538_v49 = vsel %vm2089_vm13, %v455_v36, %v527_v43 }
  0xda   : > { %v394_v51 = vsel %vm2100_vm7, %v1323_v9, %v391_v45  ;;  %v541_v52 = vpack.c.bf16 %v537_v47, %v535_v46  ;;  %v542_v53 = vpack.c.bf16 %v538_v49, %v536_v48  ;;  %vm749_vm7 = vcmask 261120  }
  0xdb   : > { %v398_v57 = vsel %vm2094_vm3, %v394_v51, 0.0  ;;  %vm771_vm3 = vcmask 523264  }
  0xdc   : > { %569 = vmatpush.bf16.msra.mxu0 %v541_v52  ;;  %582 = vmatpush.bf16.msra.mxu1 %v542_v53  ;;  %v534_v59 = vsel %vm2089_vm13, %v398_v57, %v496_v56 }
  0xdd   : > { %v487_v32 = vpop.permute.xlu0 %486 }
  0xde   : > { %v490_v60 = vsel %vm488_vm11, %v1353_v24, %v487_v32 }
  0xdf   : > { %v532_v38 = vsel %vm2089_vm13, %v379_v62, %v490_v60  ;;  %vm685_vm13 = vcmask 556032  }
  0xe0   : > { %570 = vmatpush.bf16.msra.mxu0 %v539_v61  ;;  %v540_v63 = vpack.c.bf16 %v534_v59, %v532_v38 }
  0xe1   : > { %v550_v2 = vpop.permute.xlu1 %549 }
  0xe2   : > { %583 = vmatpush.bf16.msra.mxu1 %v540_v63 }
  0xe3   : > { %1216 = vmatmul.msk.bf16.vlgmr.msra.gmra.mxu0 %vm552_vm14, %v545_v1 }
  0xe5   : > { %1217 = vmatmul.msk.bf16.vlgmr.msra.gmra.mxu1 %vm552_vm14, %v545_v1  ;;  %v738_v14 = vpop.permute.xlu0 %737  ;;  %vm352_vm14 = vcmp.lt.s32.totalorder %v1602_v54, 12 }
  0xe9   : > { %v723_v29 = vpop.permute.xlu1 %722 }
 0x160   : > { %v572_v3 = vpop.f32.mrf.mxu0 }
 0x161   : > { %v573_v4 = vadd.f32 %v572_v3, %v550_v2 }
 0x162   : > { %v585_v5 = vpop.f32.mrf.mxu1 }
 0x163   : > { %v1673_v6 = vmax.f32 %v573_v4, 0.0  ;;  %v586_v7 = vadd.f32 %v585_v5, %v550_v2 }
 0x165   : > { %v1675_v8 = vmax.f32 %v586_v7, 0.0  ;;  %v1682_v12 = vpack.i.bf16 %v1673_v6, %v1450_v0 }
 0x167   : > { %v1370_v9 = vpack.i.bf16 %v1675_v8, %v1673_v6 }
 0x168   : > { %v574_v10 = vpop.f32.mrf.mxu0 }
 0x169   : > { %1371 = vrot.lane.b32.xlu0 %v1370_v9, %s1461_s28  ;;  %1356 = vrot.lane.b32.xlu2 %v1370_v9, %s1459_s23  ;;  %s1472_s28 = smov 2  }
 0x16a   : > { %v587_v11 = vpop.f32.mrf.mxu1 }
 0x171   : > { %1376 = vrot.lane.b32.xlu0 %v1682_v12, %s1462_s29  ;;  %1361 = vrot.lane.b32.xlu2 %v1450_v0, %s1463_s11 }
 0x179   : > { %1386 = vrot.lane.b32.xlu0 %v1682_v12, %s1464_s12  ;;  %1366 = vrot.lane.b32.xlu2 %v1370_v9, %s1463_s11 }
 0x181   : > { %670 = vrot.lane.b32.xlu0 %v1450_v0, %s1465_s13  ;;  %692 = vrot.lane.b32.xlu2 %v1450_v0, %s1459_s23  ;;  %s1471_s23 = smov 32  }
 0x189   : > { %657 = vrot.lane.b32.xlu0 %v1450_v0, %s1466_s14  ;;  %1391 = vrot.lane.b32.xlu2 %v1370_v9, %s1465_s13 }
 0x191   : > { %1406 = vrot.lane.b32.xlu0 %v1370_v9, %s1467_s24  ;;  %1396 = vrot.lane.b32.xlu2 %v1370_v9, %s1466_s14 }
 0x199   : > { %617 = vrot.lane.b32.xlu0 %v1675_v8, %s1468_s25  ;;  %758 = vrot.lane.b32.xlu2 %v1450_v0, %s1469_s26 }
 0x1a1   : > { %1426 = vrot.lane.b32.xlu0 %v1682_v12, %s1470_s27  ;;  %1411 = vrot.lane.b32.xlu2 %v1682_v12, %s1468_s25 }
 0x1a9   : > { %747 = vrot.lane.b32.xlu0 %v1675_v8, %s1471_s23  ;;  %630 = vrot.lane.b32.xlu2 %v1675_v8, %s1472_s28 }
 0x1b1   : > { %1431 = vrot.lane.b32.xlu2 %v1682_v12, %s1471_s23  ;;  %920 = vperm.xlu0 %1441, %v1268_v44   ;;  %v1269_v44 = vld [vmem:[%s2084_s5 + $0x10] sm:$0xff]  ;;  %s1281_s23 = sshll.u32 %s2134_s10, 4 }
 0x1b2   : > { %s332_s11 = scalar_lea.vmem %s2088_s9, %s1281_s23 }
 0x1c3   : > { %v1357_v13 = vpop.permute.xlu2 %1356 }
 0x1c4   : > { %v1359_v15 = vunpack.i.h.bf16 %v1357_v13  ;;  %v1358_v16 = vunpack.i.l.bf16 %v1357_v13 }
 0x1c6   : > { %v1707_v17 = vsel %vm698_vm15, %v1358_v16, %v1359_v15  ;;  %v739_v18 = vsel %vm698_vm15, %v1359_v15, %v738_v14 }
 0x1c7   : > { %v741_v19 = vsel %vm351_vm2, %v1707_v17, 0.0  ;;  %v742_v20 = vsel %vm352_vm14, %v739_v18, 0.0 }
 0x1c8   : > { %v1380_v21 = vpack.i.bf16 %v742_v20, %v741_v19 }
 0x1ca   : > { %1381 = vrot.lane.b32.xlu1 %v1380_v21, %s1464_s12 }
 0x1cb   : > { %v1362_v22 = vpop.permute.xlu2 %1361 }
 0x1cc   : > { %v1363_v23 = vunpack.i.l.bf16 %v1362_v22  ;;  %v1364_v55 = vunpack.i.h.bf16 %v1362_v22 }
 0x1d2   : > { %709 = vrot.lane.b32.xlu1 %v1675_v8, %s1462_s29 }
 0x1d3   : > { %v1367_v24 = vpop.permute.xlu2 %1366 }
 0x1d4   : > { %v1369_v25 = vunpack.i.h.bf16 %v1367_v24  ;;  %v1368_v27 = vunpack.i.l.bf16 %v1367_v24 }
 0x1d6   : > { %v1719_v26 = vsel %vm685_vm13, %v1369_v25, %v1363_v23  ;;  %v1726_v35 = vsel %vm685_vm13, %v1368_v27, %v1369_v25  ;;  %v686_v32 = vsel %vm685_vm13, %v1364_v55, %v1368_v27  ;;  %vm646_vm13 = vcmask 1031168   ;;  %v815_v55 = vld [vmem:[%s2082_s3] sm:$0xff] }
 0x1da   : > { %1401 = vrot.lane.b32.xlu1 %v1370_v9, %s1469_s26 }
 0x1db   : > { %v1372_v28 = vpop.permute.xlu0 %1371  ;;  %v693_v37 = vpop.permute.xlu2 %692 }
 0x1dc   : > { %v1374_v30 = vunpack.i.h.bf16 %v1372_v28  ;;  %v1373_v31 = vunpack.i.l.bf16 %v1372_v28  ;;  %v699_v56 = vsel %vm698_vm15, %v693_v37, %v1358_v16  ;;  %vm1227_vm15 = vmpackc.low %vm353_vm0, %vm347_vm6 }
 0x1de   : > { %v1723_v34 = vsel %vm724_vm12, %v1374_v30, %v723_v29  ;;  %v725_v36 = vsel %vm724_vm12, %v1373_v31, %v1374_v30 }
 0x1df   : > { %v1244_v39 = vpack.c.bf16 %v1719_v26, %v1723_v34  ;;  %v1219_v40 = vpack.c.bf16 %v1726_v35, %v725_v36  ;;  %v1274_v36 = vld [vmem:[%s2084_s5 + $0x38] sm:$0xff] }
 0x1e1   : > { %1220 = vmatpush.bf16.msk.msra.mxu2 %vm1218_vm9, %v1219_v40  ;;  %vm1473_vm9 = vmmov 1  }
 0x1e2   : > { %644 = vrot.lane.b32.xlu1 %v1450_v0, %s1467_s24  ;;  %vm1221_vm12 = vmpackc.low %vm1473_vm9, %vm353_vm0  ;;  %vm349_vm0 = vcmp.ge.s32.totalorder %v1596_v50, 2 }
 0x1e3   : > { %v1737_v41 = vpop.permute.xlu0 %1376  ;;  %v1392_v47 = vpop.permute.xlu2 %1391  ;;  %vm1236_vm5 = vmpackc.low %vm349_vm0, %vm347_vm6 }
 0x1e4   : > { %v1379_v42 = vunpack.i.h.bf16 %v1737_v41  ;;  %v1378_v43 = vunpack.i.l.bf16 %v1737_v41  ;;  %v1394_v49 = vunpack.i.h.bf16 %v1392_v47  ;;  %v1393_v51 = vunpack.i.l.bf16 %v1392_v47 }
 0x1e6   : > { %v712_v45 = vsel %vm711_vm4, %v1378_v43, %v1379_v42  ;;  %v673_v58 = vsel %vm672_vm10, %v1393_v51, %v1394_v49  ;;  %v1271_v51 = vld [vmem:[%s2084_s5 + $0x20] sm:$0xff] }
 0x1e7   : > { %v1222_v46 = vpack.c.bf16 %v1673_v6, %v712_v45  ;;  %v1228_v60 = vpack.c.bf16 %v686_v32, %v673_v58  ;;  %v1272_v45 = vld [vmem:[%s2084_s5 + $0x28] sm:$0xff]  ;;  %v824_v32 = vunpack.c.h.b16 %v815_v55 }
 0x1e9   : > { %1223 = vmatpush.bf16.msk.msra.mxu2 %vm1221_vm12, %v1222_v46  ;;  %vm1224_vm12 = vmpackc.low %vm351_vm2, %vm1473_vm9  ;;  %vm659_vm2 = vcmask 801792   ;;  %v891_v46 = vld [vmem:[%s2084_s5] sm:$0xff] }
 0x1ea   : > { %909 = vperm.xlu0 %1441, %v891_v46  }
 0x1eb   : > { %v1751_v48 = vpop.permute.xlu0 %1386  ;;  %v1397_v38 = vpop.permute.xlu2 %1396 }
 0x1ec   : > { %v1389_v52 = vunpack.i.h.bf16 %v1751_v48  ;;  %v1388_v53 = vunpack.i.l.bf16 %v1751_v48  ;;  %v1399_v63 = vunpack.i.h.bf16 %v1397_v38  ;;  %v1398_v13 = vunpack.i.l.bf16 %v1397_v38 }
 0x1ee   : > { %v772_v57 = vsel %vm771_vm3, %v1388_v53, %v1389_v52  ;;  %v660_v21 = vsel %vm659_vm2, %v1398_v13, %v1399_v63 }
 0x1ef   : > { %v1225_v33 = vpack.c.bf16 %v699_v56, %v772_v57 }
 0x1f1   : > { %1226 = vmatpush.bf16.msk.msra.mxu2 %vm1224_vm12, %v1225_v33  ;;  %vm1790_vm12 = vmpackc.low %vm1473_vm9, %vm349_vm0  ;;  %v816_v33 = vld [vmem:[%s2083_s4] sm:$0xff]  ;;  %vm2108_vm0 = vcmp.lt.s32.totalorder %v1596_v50, 15 }
 0x1f2   : > { %991 = vperm.xlu0 %1441, %v1271_v51   ;;  %819 = vperm.xlu2 %1440, %v816_v33  }
 0x1f3   : > { %v671_v59 = vpop.permute.xlu0 %670  ;;  %v759_v20 = vpop.permute.xlu2 %758 }
 0x1f4   : > { %v1768_v61 = vsel %vm672_vm10, %v1394_v49, %v671_v59  ;;  %vm760_vm10 = vcmask 785408  }
 0x1f5   : > { %v1253_v62 = vpack.c.bf16 %v1726_v35, %v1768_v61  ;;  %1229 = vmatpush.bf16.msk.msra.mxu2 %vm1227_vm15, %v1228_v60  ;;  %vm1233_vm15 = vmpackc.low %vm347_vm6, %vm1473_vm9  ;;  %vm350_vm6 = vcmp.ge.s32.totalorder %v1602_v54, 2 }
 0x1fa   : > { %1005 = vrot.lane.b32.xlu0 %v1450_v0, %s1454_s18  ;;  %895 = vrot.lane.b32.xlu2 %v1450_v0, %s1451_s15 }
 0x1fb   : > { %v658_v1 = vpop.permute.xlu0 %657  ;;  %v1841_v49 = vpop.permute.xlu2 %1411 }
 0x1fc   : > { %v1773_v2 = vsel %vm659_vm2, %v1399_v63, %v658_v1  ;;  %vm354_vm2 = vcmp.ge.s32.totalorder %v1602_v54, 4  ;;  %v1874_v1 = vpack.c.b16 %v824_v32, %v824_v32  ;;  %v1414_v48 = vunpack.i.h.bf16 %v1841_v49 }
 0x202   : > { %966 = vrot.lane.b32.xlu2 %v1450_v0, %s1453_s17 }
 0x203   : > { %v1781_v11 = vpop.permute.xlu0 %1406  ;;  %v1851_v56 = vpop.permute.xlu2 %630 }
 0x204   : > { %v1409_v15 = vunpack.i.h.bf16 %v1781_v11  ;;  %v1408_v16 = vunpack.i.l.bf16 %v1781_v11 }
 0x206   : > { %v647_v28 = vsel %vm646_vm13, %v1408_v16, %v1409_v15 }
 0x207   : > { %v1234_v29 = vpack.c.bf16 %v647_v28, %v1673_v6 }
 0x20b   : > { %v1809_v30 = vpop.permute.xlu0 %617  ;;  %v1432_v41 = vpop.permute.xlu2 %1431 }
 0x213   : > { %v1814_v31 = vpop.permute.xlu0 %1426 }
 0x214   : > { %v1429_v34 = vunpack.i.h.bf16 %v1814_v31 }
 0x21b   : > { %v1820_v37 = vpop.permute.xlu0 %747 }
 0x223   : > { %v1824_v40 = vpop.permute.xlu0 %920 }
 0x224   : > { %v923_v43 = vmul.f32 0.0, %v1824_v40 }
 0x23c   : > { %v1382_v3 = vpop.permute.xlu1 %1381 }
 0x23d   : > { %v1383_v4 = vunpack.i.l.bf16 %v1382_v3  ;;  %v1384_v7 = vunpack.i.h.bf16 %v1382_v3 }
 0x23f   : > { %v1415_v5 = vpack.i.bf16 %v1383_v4, %v1675_v8  ;;  %v782_v10 = vsel %vm771_vm3, %v1383_v4, %v1384_v7 }
 0x241   : > { %1416 = vrot.lane.b32.xlu1 %v1415_v5, %s1464_s12 }
 0x244   : > { %v1777_v9 = vpop.permute.xlu1 %709 }
 0x245   : > { %v713_v3 = vsel %vm711_vm4, %v1379_v42, %v1777_v9  ;;  %vm632_vm4 = vcmask 15360  }
 0x246   : > { %v1247_v42 = vpack.c.bf16 %v1675_v8, %v713_v3  ;;  %v1093_v3 = vld [vmem:[%s2085_s6] sm:$0xff] }
 0x249   : > { %787 = vrot.lane.b32.xlu1 %v782_v10, %s1464_s12  ;;  %v1433_v10 = vunpack.i.l.bf16 %v1432_v41 }
 0x24c   : > { %v1402_v14 = vpop.permute.xlu1 %1401 }
 0x24d   : > { %v1404_v18 = vunpack.i.h.bf16 %v1402_v14  ;;  %v1403_v19 = vunpack.i.l.bf16 %v1402_v14 }
 0x24f   : > { %v761_v22 = vsel %vm760_vm10, %v1403_v19, %v1404_v18  ;;  %v1794_v24 = vsel %vm760_vm10, %v1404_v18, %v759_v20  ;;  %vm1243_vm10 = vmpackc.low %vm354_vm2, %vm352_vm14  ;;  %v823_v19 = vunpack.c.l.b16 %v815_v55 }
 0x250   : > { %v1231_v25 = vpack.c.bf16 %v761_v22, %v660_v21  ;;  %v1256_v27 = vpack.c.bf16 %v1794_v24, %v1773_v2  ;;  %v621_v2 = vsel %vm619_vm1, %v1414_v48, %v1809_v30 }
 0x251   : > { %1421 = vrot.lane.b32.xlu1 %v1682_v12, %s1472_s28  ;;  %v1435_v12 = vpack.i.bf16 %v1384_v7, %v1450_v0  ;;  %v1434_v7 = vunpack.i.h.bf16 %v1432_v41  ;;  %v825_v28 = vpack.c.b16 %v823_v19, %v823_v19 }
 0x252   : > { %1232 = vmatpush.bf16.msk.msra.mxu2 %vm1790_vm12, %v1231_v25 }
 0x253   : > { %v751_v22 = vsel %vm749_vm7, %v1434_v7, %v1820_v37  ;;  %v1273_v37 = vld [vmem:[%s2084_s5 + $0x30] sm:$0xff] }
 0x254   : > { %v1839_v47 = vpop.permute.xlu1 %644 }
 0x255   : > { %v648_v35 = vsel %vm646_vm13, %v1409_v15, %v1839_v47  ;;  %vm2109_vm13 = vcmp.ge.s32.totalorder %v1596_v50, 1 }
 0x256   : > { %1235 = vmatpush.bf16.msk.msra.mxu2 %vm1233_vm15, %v1234_v29  ;;  %vm1246_vm15 = vmpackc.low %vm1473_vm9, %vm354_vm2  ;;  %v1259_v61 = vpack.c.bf16 %v648_v35, %v1675_v8 }
 0x259   : > { %604 = vrot.lane.b32.xlu1 %v1675_v8, %s1470_s27 }
 0x261   : > { %1436 = vrot.lane.b32.xlu1 %v1435_v12, %s1464_s12 }
 0x269   : > { %1049 = vperm.xlu1 %1354, %v1274_v36  }
 0x271   : > { %943 = vrot.lane.b32.xlu1 %v1450_v0, %s1452_s16 }
 0x279   : > { %929 = vrot.lane.b32.xlu1 %v923_v43, %s1457_s21 }
 0x281   : > { %957 = vperm.xlu1 %1354, %v1269_v44  }
 0x289   : > { %1015 = vperm.xlu1 %1354, %v1272_v45   ;;  %v820_v45 = vpop.permute.xlu2 %819 }
 0x291   : > { %1028 = vrot.lane.b32.xlu1 %v1450_v0, %s1455_s19  ;;  %v896_v41 = vpop.permute.xlu2 %895 }
 0x2b3   : > { %v1846_v53 = vpop.permute.xlu1 %1416 }
 0x2b4   : > { %v1418_v57 = vunpack.i.l.bf16 %v1846_v53  ;;  %v1419_v58 = vunpack.i.h.bf16 %v1846_v53 }
 0x2b6   : > { %v773_v60 = vsel %vm771_vm3, %v1389_v52, %v1418_v57  ;;  %v1413_v52 = vunpack.i.l.bf16 %v1841_v49 }
 0x2b7   : > { %v1250_v13 = vpack.c.bf16 %v1707_v17, %v773_v60  ;;  %v750_v17 = vsel %vm749_vm7, %v1433_v10, %v1434_v7 }
 0x2b8   : > { %v620_v9 = vsel %vm619_vm1, %v1413_v52, %v1414_v48  ;;  %v1108_v52 = vld [vmem:[%s2087_s8] sm:$0xff]  ;;  %vm2105_vm1 = vcmask 121856  }
 0x2bb   : > { %v1861_v59 = vpop.permute.xlu1 %787 }
 0x2bc   : > { %v792_v38 = vsel %vm771_vm3, %v1419_v58, %v1861_v59 }
 0x2bd   : > { %v813_v63 = vpack.c.bf16 %v792_v38, %v773_v60 }
 0x2bf   : > { %851 = vmatpush.bf16.msra.mxu3 %v813_v63 }
 0x2c2   : > { %1242 = vmatmul.msk.bf16.vlgmr.msra.gmra.mxu3 %vm488_vm11, %v1874_v1 }
 0x2c3   : > { %1245 = vmatpush.bf16.msk.msrb.mxu3 %vm1243_vm10, %v1244_v39  ;;  %v1422_v26 = vpop.permute.xlu1 %1421  ;;  %v1428_v39 = vunpack.i.l.bf16 %v1814_v31  ;;  %vm1249_vm10 = vmpackc.low %vm352_vm14, %vm1473_vm9  ;;  %v1270_v31 = vld [vmem:[%s2084_s5 + $0x18] sm:$0xff] }
 0x2c4   : > { %v1424_v4 = vunpack.i.h.bf16 %v1422_v26  ;;  %v1423_v5 = vunpack.i.l.bf16 %v1422_v26  ;;  %980 = vperm.xlu2 %1440, %v1270_v31  }
 0x2c5   : > { %v607_v18 = vsel %vm606_vm8, %v1428_v39, %v1429_v34 }
 0x2c6   : > { %v633_v14 = vsel %vm632_vm4, %v1423_v5, %v1424_v4  ;;  %v1240_v21 = vpack.c.bf16 %v750_v17, %v607_v18  ;;  %v634_v11 = vsel %vm632_vm4, %v1424_v4, %v1851_v56  ;;  %v910_v5 = vpop.permute.xlu0 %909  ;;  %vm2112_vm4 = vmmov %vm2105_vm1 }
 0x2c7   : > { %1248 = vmatpush.bf16.msk.msrb.mxu3 %vm1246_vm15, %v1247_v42  ;;  %vm348_vm15 = vcmp.lt.s32.totalorder %v1602_v54, 14  ;;  %v1237_v16 = vpack.c.bf16 %v633_v14, %v620_v9  ;;  %v1262_v24 = vpack.c.bf16 %v634_v11, %v621_v2  ;;  %v967_v42 = vpop.permute.xlu2 %966 }
 0x2c8   : > { %vm1252_vm14 = vmpackc.low %vm354_vm2, %vm348_vm15 }
 0x2c9   : > { %1238 = vmatpush.bf16.msk.msra.mxu2 %vm1236_vm5, %v1237_v16  ;;  %vm1924_vm5 = vmpackc.low %vm1473_vm9, %vm350_vm6 }
 0x2ca   : > { %vm1258_vm7 = vmpackc.low %vm348_vm15, %vm1473_vm9  ;;  %vm2107_vm9 = vcmask 138240  }
 0x2cb   : > { %1251 = vmatpush.bf16.msk.msrb.mxu3 %vm1249_vm10, %v1250_v13  ;;  %v605_v20 = vpop.permute.xlu1 %604  ;;  %vm2111_vm2 = vmmov %vm2107_vm9  ;;  %vm2113_vm10 = vcmp.ge.s32.totalorder %v1602_v54, 1 }
 0x2cc   : > { %v608_v25 = vsel %vm606_vm8, %v1429_v34, %v605_v20  ;;  %vm1261_vm8 = vmpackc.low %vm350_vm6, %vm348_vm15  ;;  %1038 = vperm.xlu2 %1440, %v1273_v37  }
 0x2cd   : > { %v1265_v29 = vpack.c.bf16 %v751_v22, %v608_v25  ;;  %1241 = vmatpush.bf16.msk.msra.mxu2 %vm1790_vm12, %v1240_v21  ;;  %vm2110_vm12 = vmmov %vm2109_vm13 }
 0x2ce   : > { %v992_v10 = vpop.permute.xlu0 %991  ;;  %vm2116_vm6 = vmmov %vm2113_vm10 }
 0x2cf   : > { %1254 = vmatpush.bf16.msk.msrb.mxu3 %vm1252_vm14, %v1253_v62  ;;  %vm2115_vm14 = vcmp.lt.s32.totalorder %v1602_v54, 15 }
 0x2d0   : > { %839 = vmatmul.bf16.vlgmr.msra.gmra.mxu2 %v825_v28 }
 0x2d3   : > { %1257 = vmatpush.bf16.msk.msrb.mxu3 %vm1924_vm5, %v1256_v27  ;;  %v1437_v62 = vpop.permute.xlu1 %1436 }
 0x2d4   : > { %v1439_v23 = vunpack.i.h.bf16 %v1437_v62  ;;  %v1438_v15 = vunpack.i.l.bf16 %v1437_v62  ;;  %1076 = vrot.lane.b32.xlu2 %v1450_v0, %s1456_s20 }
 0x2d6   : > { %v791_v27 = vsel %vm771_vm3, %v1418_v57, %v1438_v15  ;;  %v793_v36 = vsel %vm771_vm3, %v1861_v59, %v1439_v23  ;;  %v1006_v16 = vpop.permute.xlu0 %1005  ;;  %vm2106_vm3 = vcmask 7168  }
 0x2d7   : > { %1260 = vmatpush.bf16.msk.msrb.mxu3 %vm1258_vm7, %v1259_v61  ;;  %v814_v43 = vpack.c.bf16 %v793_v36, %v791_v27  ;;  %vm2114_vm15 = vmmov %vm2106_vm3 }
 0x2d9   : > { %877 = vmatpush.bf16.msrb.mxu0 %v814_v43 }
 0x2db   : > { %1263 = vmatpush.bf16.msk.msrb.mxu3 %vm1261_vm8, %v1262_v24  ;;  %v1050_v60 = vpop.permute.xlu1 %1049  ;;  %vm2119_vm8 = vmmov %vm2115_vm14 }
 0x2dc   : > { %1267 = vmatmul.msk.bf16.vlgmr.msrb.gmra.mxu0 %vm488_vm11, %v1874_v1  ;;  %v1054_v1 = vmul.f32 0.0, %v1050_v60 }
 0x2df   : > { %1266 = vmatpush.bf16.msk.msrb.mxu3 %vm1924_vm5, %v1265_v29  ;;  %vm2117_vm5 = vcmask 1039360  }
 0x2e0   : > { %vm2118_vm7 = vmmov %vm2117_vm5 }
 0x2e2   : > { %865 = vmatmul.bf16.vlgmr.msrb.gmra.mxu3 %v825_v28 }
 0x2e3   : > { %v944_v26 = vpop.permute.xlu1 %943 }
 0x2eb   : > { %v930_v39 = vpop.permute.xlu1 %929 }
 0x2f3   : > { %v958_v9 = vpop.permute.xlu1 %957 }
 0x2fb   : > { %v1016_v14 = vpop.permute.xlu1 %1015 }
 0x303   : > { %v1029_v18 = vpop.permute.xlu1 %1028 }
 0x31e   : > { %v981_v34 = vpop.permute.xlu2 %980 }
 0x326   : > { %v2014_v4 = vpop.permute.xlu2 %1038 }
 0x32e   : > { %v2016_v7 = vpop.permute.xlu2 %1076 }
 0x345   : > { %v853_v30 = vpop.f32.mrf.mxu3 }
 0x34d   : > { %v855_v44 = vpop.f32.mrf.mxu3 }
 0x353   : > { %v840_v46 = vpop.f32.mrf.mxu2 }
 0x354   : > { %v841_v47 = vadd.f32 %v840_v46, %v820_v45 }
 0x356   : > { %v854_v49 = vadd.f32 %v853_v30, %v841_v47 }
 0x358   : > { %v1966_v51 = vmax.f32 %v854_v49, 0.0 }
 0x359   : > { %v879_v53 = vpop.f32.mrf.mxu0 }
 0x35a   : > { %968 = vrot.lane.b32.xlu0 %v1966_v51, %s1453_s17  ;;  %945 = vrot.lane.b32.xlu2 %v1966_v51, %s1452_s16  ;;  %v924_v32 = vmul.f32 %v1824_v40, %v1966_v51  ;;  %v1052_v48 = vmul.f32 %v1050_v60, %v1966_v51  ;;  %v994_v27 = vmul.f32 %v992_v10, %v1966_v51 }
 0x35b   : > { %897 = vrot.lane.b32.xlu1 %v1966_v51, %s1451_s15  ;;  %v842_v55 = vpop.f32.mrf.mxu2 }
 0x361   : > { %v881_v0 = vpop.f32.mrf.mxu0 }
 0x362   : > { %1072 = vrot.lane.b32.xlu0 %v1966_v51, %s1456_s20  ;;  %1024 = vrot.lane.b32.xlu2 %v1966_v51, %s1455_s19 }
 0x363   : > { %1001 = vrot.lane.b32.xlu1 %v1966_v51, %s1454_s18 }
 0x365   : > { %v866_v56 = vpop.f32.mrf.mxu3 }
 0x366   : > { %v867_v57 = vadd.f32 %v866_v56, %v820_v45 }
 0x368   : > { %v880_v33 = vadd.f32 %v879_v53, %v867_v57 }
 0x36a   : > { %v1980_v58 = vmax.f32 %v880_v33, 0.0  ;;  %931 = vrot.lane.b32.xlu2 %v924_v32, %s1457_s21 }
 0x36c   : > { %947 = vrot.lane.b32.xlu0 %v1980_v58, %s1452_s16  ;;  %970 = vrot.lane.b32.xlu1 %v1980_v58, %s1453_s17  ;;  %v925_v38 = vmul.f32 %v1824_v40, %v1980_v58  ;;  %v1053_v63 = vmul.f32 %v1050_v60, %v1980_v58  ;;  %v1275_v40 = vld [vmem:[%s2084_s5 + $0x40] sm:$0xff] }
 0x36d   : > { %v868_v59 = vpop.f32.mrf.mxu3 }
 0x372   : > { %899 = vrot.lane.b32.xlu2 %v1980_v58, %s1451_s15 }
 0x374   : > { %1026 = vrot.lane.b32.xlu0 %v1980_v58, %s1455_s19  ;;  %1074 = vrot.lane.b32.xlu1 %v1980_v58, %s1456_s20 }
 0x37a   : > { %1003 = vrot.lane.b32.xlu2 %v1980_v58, %s1454_s18 }
 0x37c   : > { %933 = vrot.lane.b32.xlu0 %v925_v38, %s1457_s21  ;;  %1060 = vrot.lane.b32.xlu1 %v1053_v63, %s1458_s22 }
 0x382   : > { %1062 = vrot.lane.b32.xlu2 %v1054_v1, %s1458_s22 }
 0x384   : > { %1058 = vrot.lane.b32.xlu0 %v1052_v48, %s1458_s22  ;;  %1096 = vperm.xlu1 %1354, %v1093_v3  }
 0x38a   : > { %1111 = vperm.xlu2 %1440, %v1108_v52  }
 0x38c   : > { %1086 = vperm.xlu0 %1441, %v1275_v40  }
 0x3b4   : > { %v946_v13 = vpop.permute.xlu2 %945 }
 0x3b5   : > { %v949_v17 = vsel %vm2105_vm1, %v944_v26, %v946_v13  ;;  %vm2120_vm1 = vcmask 924672  }
 0x3b6   : > { %v953_v29 = vsel %vm2108_vm0, %v949_v17, 0.0 }
 0x3b7   : > { %v960_v62 = vmul.f32 %v958_v9, %v953_v29 }
 0x3bc   : > { %v1025_v19 = vpop.permute.xlu2 %1024 }
 0x3c4   : > { %v932_v22 = vpop.permute.xlu2 %931 }
 0x3c5   : > { %v935_v35 = vsel %vm488_vm11, %v930_v39, %v932_v22  ;;  %v995_v39 = vmul.f32 %v992_v10, %v1980_v58 }
 0x3cc   : > { %v969_v20 = vpop.permute.xlu0 %968  ;;  %v900_v30 = vpop.permute.xlu2 %899 }
 0x3cd   : > { %v898_v21 = vpop.permute.xlu1 %897  ;;  %v972_v25 = vsel %vm2106_vm3, %v967_v42, %v969_v20  ;;  %vm2121_vm3 = vmmov %vm2120_vm1 }
 0x3ce   : > { %v901_v28 = vsel %vm2107_vm9, %v896_v41, %v898_v21  ;;  %v976_v61 = vsel %vm2110_vm12, %v972_v25, 0.0  ;;  %v902_v46 = vsel %vm2111_vm2, %v898_v21, %v900_v30  ;;  %vm2122_vm9 = vmmov %vm2108_vm0  ;;  %vm2127_vm2 = vcmask 916480  }
 0x3cf   : > { %v905_v12 = vsel %vm2109_vm13, %v901_v28, 0.0  ;;  %v983_v23 = vmul.f32 %v981_v34, %v976_v61  ;;  %v906_v49 = vsel %vm2113_vm10, %v902_v46, 0.0  ;;  %vm2124_vm0 = vmmov %vm2116_vm6  ;;  %vm2125_vm13 = vcmask 908288  }
 0x3d0   : > { %v912_v31 = vmul.f32 %v910_v5, %v905_v12  ;;  %v913_v56 = vmul.f32 %v910_v5, %v906_v49  ;;  %vm2129_vm10 = vmmov %vm2122_vm9  ;;  %v1104_v46 = vpack.c.bf16 %v1980_v58, %v1675_v8 }
 0x3d2   : > { %v939_v11 = vadd.f32 %v935_v35, %v912_v31 }
 0x3d4   : > { %v962_v15 = vadd.f32 %v960_v62, %v939_v11  ;;  %v1073_v2 = vpop.permute.xlu0 %1072  ;;  %v1004_v55 = vpop.permute.xlu2 %1003 }
 0x3d5   : > { %v1002_v36 = vpop.permute.xlu1 %1001  ;;  %v1008_v60 = vsel %vm2117_vm5, %v1004_v55, %v1006_v16  ;;  %vm1114_vm5 = vcmask 195584  }
 0x3d6   : > { %v985_v24 = vadd.f32 %v983_v23, %v962_v15  ;;  %v1007_v1 = vsel %vm2118_vm7, %v1002_v36, %v1004_v55  ;;  %v1012_v40 = vsel %vm2119_vm8, %v1008_v60, 0.0 }
 0x3d7   : > { %v1011_v42 = vsel %vm2122_vm9, %v1007_v1, 0.0  ;;  %v1019_v5 = vmul.f32 %v1016_v14, %v1012_v40 }
 0x3d8   : > { %v996_v37 = vadd.f32 %v994_v27, %v985_v24  ;;  %v1018_v17 = vmul.f32 %v1016_v14, %v1011_v42 }
 0x3dc   : > { %v1063_v12 = vpop.permute.xlu2 %1062 }
 0x3de   : > { %v948_v43 = vpop.permute.xlu0 %947  ;;  %v971_v44 = vpop.permute.xlu1 %970 }
 0x3df   : > { %v950_v47 = vsel %vm2112_vm4, %v946_v13, %v948_v43  ;;  %v973_v53 = vsel %vm2114_vm15, %v969_v20, %v971_v44  ;;  %vm2128_vm4 = vmmov %vm2127_vm2 }
 0x3e0   : > { %v954_v0 = vsel %vm2115_vm14, %v950_v47, 0.0  ;;  %v977_v32 = vsel %vm2116_vm6, %v973_v53, 0.0  ;;  %vm2130_vm15 = vmmov %vm2119_vm8  ;;  %vm2131_vm14 = vcmask 1043456   ;;  %v1107_v47 = vld [vmem:[%s2086_s7] sm:$0xf] }
 0x3e1   : > { %v961_v38 = vmul.f32 %v958_v9, %v954_v0  ;;  %v984_v3 = vmul.f32 %v981_v34, %v977_v32  ;;  %vm2132_vm6 = vmmov %vm2131_vm14 }
 0x3e4   : > { %v1112_v49 = vpop.permute.xlu2 %1111 }
 0x3e6   : > { %v1027_v45 = vpop.permute.xlu0 %1026  ;;  %v1075_v57 = vpop.permute.xlu1 %1074 }
 0x3e7   : > { %v1030_v52 = vsel %vm2120_vm1, %v1025_v19, %v1027_v45  ;;  %v1031_v41 = vsel %vm2121_vm3, %v1027_v45, %v1029_v18  ;;  %v1078_v25 = vsel %vm2125_vm13, %v1073_v2, %v1075_v57  ;;  %v1103_v45 = vpack.c.bf16 %v1966_v51, %v1673_v6 }
 0x3e8   : > { %v1035_v34 = vsel %vm2124_vm0, %v1031_v41, 0.0  ;;  %v1082_v14 = vsel %vm2129_vm10, %v1078_v25, 0.0 }
 0x3e9   : > { %v1042_v21 = vmul.f32 %v2014_v4, %v1035_v34 }
 0x3ee   : > { %v934_v33 = vpop.permute.xlu0 %933  ;;  %v1061_v20 = vpop.permute.xlu1 %1060 }
 0x3ef   : > { %v936_v59 = vsel %vm488_vm11, %v932_v22, %v934_v33  ;;  %vm2123_vm11 = vmmov %vm2110_vm12  ;;  %v1020_v22 = vadd.f32 %v1018_v17, %v996_v37  ;;  %v1065_v35 = vsel %vm2128_vm4, %v1061_v20, %v1063_v12 }
 0x3f0   : > { %v940_v63 = vadd.f32 %v936_v59, %v913_v56  ;;  %v1034_v9 = vsel %vm2123_vm11, %v1030_v52, 0.0  ;;  %vm2126_vm12 = vmmov %vm2125_vm13 }
 0x3f1   : > { %v1041_v18 = vmul.f32 %v2014_v4, %v1034_v9  ;;  %v1079_v10 = vsel %vm2126_vm12, %v1075_v57, %v2016_v7 }
 0x3f2   : > { %v963_v48 = vadd.f32 %v961_v38, %v940_v63  ;;  %v1083_v61 = vsel %vm2130_vm15, %v1079_v10, 0.0 }
 0x3f3   : > { %v1043_v31 = vadd.f32 %v1041_v18, %v1020_v22 }
 0x3f4   : > { %v986_v26 = vadd.f32 %v984_v3, %v963_v48 }
 0x3f6   : > { %v997_v13 = vadd.f32 %v995_v39, %v986_v26  ;;  %v1059_v16 = vpop.permute.xlu0 %1058  ;;  %v1097_v24 = vpop.permute.xlu1 %1096 }
 0x3f7   : > { %v1064_v29 = vsel %vm2127_vm2, %v1059_v16, %v1061_v20 }
 0x3f8   : > { %v1021_v19 = vadd.f32 %v1019_v5, %v997_v13  ;;  %v1068_v11 = vadd.f32 %v1064_v29, %v1043_v31 }
 0x3fa   : > { %v1044_v28 = vadd.f32 %v1042_v21, %v1021_v19 }
 0x3fc   : > { %v1069_v62 = vadd.f32 %v1065_v35, %v1044_v28 }
 0x3fe   : > { %v1087_v4 = vpop.permute.xlu0 %1086 }
 0x3ff   : > { %v1089_v23 = vmul.f32 %v1087_v4, %v1082_v14  ;;  %v1090_v15 = vmul.f32 %v1087_v4, %v1083_v61 }
 0x401   : > { %v1091_v2 = vadd.f32 %v1089_v23, %v1068_v11  ;;  %v1092_v7 = vadd.f32 %v1090_v15, %v1069_v62 }
 0x403   : > { %v1100_v27 = vadd.f32 %v1097_v24, %v1092_v7  ;;  %v1099_v36 = vadd.f32 %v1097_v24, %v1091_v2 }
 0x405   : > { %v1102_v37 = vmax.f32 %v1100_v27, 0.0  ;;  %v1101_v43 = vmax.f32 %v1099_v36, 0.0 }
 0x407   : > { %v1105_v30 = vpack.c.bf16 %v1101_v43, %v1101_v43  ;;  %v1106_v44 = vpack.c.bf16 %v1102_v37, %v1102_v37 }
 0x409   : > { %v1119_v50 = vsel %vm2131_vm14, %v1105_v30, 0  ;;  %v1122_v54 = vsel %vm2132_vm6, %v1106_v44, 0 }
 0x40a   : > { %1130 = vmatpush.bf16.msrb.mxu1 %v1119_v50  ;;  %1143 = vmatpush.bf16.msra.mxu0 %v1122_v54 }
 0x40e   : > { %1131 = vmatpush.bf16.msrb.mxu1 %v1103_v45  ;;  %1144 = vmatpush.bf16.msra.mxu0 %v1104_v46 }
 0x411   : > { %1276 = vmatmul.msk.bf16.vlgmr.msrb.gmra.mxu1 %vm1114_vm5, %v1107_v47  ;;  %1277 = vmatmul.msk.bf16.vlgmr.msra.gmra.mxu0 %vm1114_vm5, %v1107_v47 }
 0x48e   : > { %v1133_v53 = vpop.f32.mrf.mxu1  ;;  %v1146_v6 = vpop.f32.mrf.mxu0 }
 0x48f   : > { %v1134_v51 = vadd.f32 %v1133_v53, %v1112_v49  ;;  %v1147_v55 = vadd.f32 %v1146_v6, %v1112_v49 }
 0x491   : > { %1150 = vst [vmem:[%s332_s11] sm:$0xff] %v1134_v51 }
 0x492   : > { %1151 = vst [vmem:[%s332_s11 + $0x8] sm:$0xff] %v1147_v55 }
 0x496   : > { %v1135_v8 = vpop.f32.mrf.mxu1  ;;  %v1148_v58 = vpop.f32.mrf.mxu0 }
 0x497 PF: > { %s19_s30 = sadd.s32 1, %s1448_s30  }
 0x498   : > { %p16_p4 = scmp.ge.s32.totalorder %s19_s30, 4  }
 0x49a   :  { %18 = sbr.rel (!%p16_p4) target bundleno = 1 (0x1), region = 105 }

</bundles_post_ra>
